<compile_context>
chip_gen: v6e
topology: v6e:2x2x1
jax: 0.10.0
libtpu: 0.0.40
codegen_flags: <defaults>
</compile_context>

<pallas_src>
import numpy as np
import jax
import jax.numpy as jnp
from jax.experimental import pallas as pl
from jax.experimental.pallas import tpu as pltpu


def conv3d_kernel(x_ref, y_ref, wx_ref, wy_ref, b_ref, o_ref, xs_ref, ys_ref):
    """One batch element per grid step.

    x_ref, y_ref  : (1, D, H, W*C)    channels-last inputs, (W, C) fused in lanes
    wx_ref, wy_ref: (9, W*C, NP)      banded weights per (kd, kh) tap, N padded to 128
    b_ref         : (1, NP)           bias tiled over W, zero padded
    o_ref         : (1, D*H, NP)      lane-dense output slab
    xs_ref, ys_ref: (D+2, H+2, W*C)   VMEM scratch holding the zero D/H halo
    """
    _, D, H, K = x_ref.shape
    NP = o_ref.shape[-1]
    DH = D * H

    # Zero-fill halo and place the interior (replaces wrapper-side jnp.pad).
    xs_ref[...] = jnp.zeros_like(xs_ref)
    ys_ref[...] = jnp.zeros_like(ys_ref)
    xs_ref[pl.ds(1, D), pl.ds(1, H), :] = x_ref[0]
    ys_ref[pl.ds(1, D), pl.ds(1, H), :] = y_ref[0]

    # Bias hoisted into the accumulator init (single broadcast, f32 accumulate).
    acc = jnp.broadcast_to(b_ref[...], (DH, NP)).astype(jnp.float32)

    for kh in range(3):
        # One unaligned H-slice + flatten per source per kh (not per tap); the
        # kd windows below are then sublane-aligned row ranges of this slab.
        xs_kh = xs_ref[:, pl.ds(kh, H), :].reshape((D + 2) * H, K)
        ys_kh = ys_ref[:, pl.ds(kh, H), :].reshape((D + 2) * H, K)
        for kd in range(3):
            t = kd * 3 + kh
            px = xs_kh[kd * H:kd * H + DH]          # (D*H, W*C)
            py = ys_kh[kd * H:kd * H + DH]
            acc = acc + jnp.dot(px, wx_ref[t], preferred_element_type=jnp.float32)
            acc = acc + jnp.dot(py, wy_ref[t], preferred_element_type=jnp.float32)

    o_ref[0] = acc.astype(o_ref.dtype)


def _banded_weights(w_half, W, NP):
    """w_half: (Cout, C, 3, 3, 3) -> (9, W*C, NP) banded matrices, one per (kd, kh).

    Column group w_out gets tap kw from input column w_in = w_out + kw - 1;
    out-of-range w_in are dropped, which implements the W-boundary zero padding.
    """
    Cout, C = w_half.shape[0], w_half.shape[1]
    wst = jnp.transpose(w_half, (2, 3, 4, 1, 0))                 # (kd, kh, kw, C, Cout)
    rel = jnp.arange(W)[:, None] - jnp.arange(W)[None, :] + 1    # kw = w_in - w_out + 1
    valid = ((rel >= 0) & (rel <= 2)).astype(w_half.dtype)       # (W_in, W_out)
    kw_idx = jnp.clip(rel, 0, 2)
    band = wst[:, :, kw_idx]                                     # (3, 3, W_in, W_out, C, Cout)
    band = band * valid[None, None, :, :, None, None]
    band = jnp.transpose(band, (0, 1, 2, 4, 3, 5))               # (3, 3, W_in, C, W_out, Cout)
    band = band.reshape(9, W * C, W * Cout)
    return jnp.pad(band, ((0, 0), (0, 0), (0, NP - W * Cout)))


def concat_skip_connection(x, y, weight, bias):
    """x, y: (N, C, D, H, W) f32 (NCDHW). weight: (C, 2C, 3, 3, 3), bias: (C,).
    Returns Conv3d(cat([x, y], dim=1), k=3, s=1, p=1): (N, C, D, H, W)."""
    N, C, D, H, W = x.shape
    Cout = weight.shape[0]
    NP = ((W * Cout + 127) // 128) * 128     # lane-dense matmul N dim / store width

    # Layout glue only: NCDHW -> (N, D, H, W*C). No concat / pad HBM passes.
    def fuse_lanes(a):
        return jnp.transpose(a, (0, 2, 3, 4, 1)).reshape(N, D, H, W * C)

    xl, yl = fuse_lanes(x), fuse_lanes(y)
    wx = _banded_weights(weight[:, :C], W, NP)    # x half of the concat channels
    wy = _banded_weights(weight[:, C:], W, NP)    # y half of the concat channels
    b_pad = jnp.pad(jnp.tile(bias, W), (0, NP - W * Cout)).reshape(1, NP)

    out_flat = pl.pallas_call(
        conv3d_kernel,
        out_shape=jax.ShapeDtypeStruct((N, D * H, NP), x.dtype),
        grid=(N,),
        in_specs=[
            pl.BlockSpec((1, D, H, W * C), lambda n: (n, 0, 0, 0)),
            pl.BlockSpec((1, D, H, W * C), lambda n: (n, 0, 0, 0)),
            pl.BlockSpec((9, W * C, NP), lambda n: (0, 0, 0)),
            pl.BlockSpec((9, W * C, NP), lambda n: (0, 0, 0)),
            pl.BlockSpec((1, NP), lambda n: (0, 0)),
        ],
        out_specs=pl.BlockSpec((1, D * H, NP), lambda n: (n, 0, 0)),
        scratch_shapes=[
            pltpu.VMEM((D + 2, H + 2, W * C), x.dtype),
            pltpu.VMEM((D + 2, H + 2, W * C), x.dtype),
        ],
        compiler_params=pltpu.CompilerParams(dimension_semantics=("parallel",)),
    )(xl, yl, wx, wy, b_pad)

    out = out_flat[:, :, : W * Cout].reshape(N, D, H, W, Cout)
    return jnp.transpose(out, (0, 4, 1, 2, 3))                   # (N, Cout, D, H, W)


def conv3d_ref(xcat, weight, bias):
    """Pure-JAX reference of Conv3d(k=3, s=1, p=1). xcat: (N, Cin, D, H, W)."""
    N, Cin, D, H, W = xcat.shape
    Cout = weight.shape[0]
    xp = jnp.pad(xcat, ((0, 0), (0, 0), (1, 1), (1, 1), (1, 1)))
    out = jnp.broadcast_to(bias[None, :, None, None, None],
                           (N, Cout, D, H, W)).astype(jnp.float32)
    for kd in range(3):
        for kh in range(3):
            for kw in range(3):
                patch = xp[:, :, kd:kd + D, kh:kh + H, kw:kw + W]
                out = out + jnp.einsum('ncdhw,oc->nodhw', patch,
                                       weight[:, :, kd, kh, kw])
    return out


if __name__ == "__main__":
    key = jax.random.PRNGKey(0)
    kx, ky, kw_, kb = jax.random.split(key, 4)

    N, C, D, H, W = 2, 4, 8, 8, 8
    x = jax.random.normal(kx, (N, C, D, H, W), jnp.float32)
    y = jax.random.normal(ky, (N, C, D, H, W), jnp.float32)

    # Conv3d(channel*2 -> channel, 3, 1, 1) parameters (PyTorch-style init scale).
    Cin = 2 * C
    fan_in = Cin * 3 * 3 * 3
    bound = 1.0 / np.sqrt(fan_in)
    weight = jax.random.uniform(kw_, (C, Cin, 3, 3, 3), jnp.float32, -bound, bound)
    bias = jax.random.uniform(kb, (C,), jnp.float32, -bound, bound)

    out = concat_skip_connection(x, y, weight, bias)
    out = jax.block_until_ready(out)

    ref = conv3d_ref(jnp.concatenate([x, y], axis=1), weight, bias)
    assert out.shape == (N, C, D, H, W)
    np.testing.assert_allclose(np.asarray(out), np.asarray(ref),
                               rtol=1e-4, atol=1e-4)
    print("KERNEL_OK")
</pallas_src>

<mosaic_0001>
module attributes {stable_mosaic.version = 11 : i64} {
  func.func @conv3d_kernel(%arg0: i32, %arg1: memref<1x8x8x32xf32, #tpu.memory_space<vmem>>, %arg2: memref<1x8x8x32xf32, #tpu.memory_space<vmem>>, %arg3: memref<9x32x128xf32, #tpu.memory_space<vmem>>, %arg4: memref<9x32x128xf32, #tpu.memory_space<vmem>>, %arg5: memref<1x128xf32, #tpu.memory_space<vmem>>, %arg6: memref<1x64x128xf32, #tpu.memory_space<vmem>>, %arg7: memref<10x10x32xf32, #tpu.memory_space<vmem>>, %arg8: memref<10x10x32xf32, #tpu.memory_space<vmem>>) attributes {dimension_semantics = [#tpu.dimension_semantics<parallel>], iteration_bounds = array<i64: 2>, scalar_prefetch = 0 : i64, scratch_operands = 2 : i64, tpu.core_type = #tpu.core_type<tc>, window_params = [{transform_indices = @transform_0, window_bounds = array<i64: 1, 8, 8, 32>}, {transform_indices = @transform_1, window_bounds = array<i64: 1, 8, 8, 32>}, {pipeline_mode = #tpu.pipeline_mode<synchronous>, transform_indices = @transform_2, window_bounds = array<i64: 9, 32, 128>}, {pipeline_mode = #tpu.pipeline_mode<synchronous>, transform_indices = @transform_3, window_bounds = array<i64: 9, 32, 128>}, {pipeline_mode = #tpu.pipeline_mode<synchronous>, transform_indices = @transform_4, window_bounds = array<i64: 1, 128>}, {transform_indices = @transform_5, window_bounds = array<i64: 1, 64, 128>}]} {
    %cst = arith.constant 0.000000e+00 : f32
    %0 = vector.broadcast %cst : f32 to vector<10x10x32xf32>
    %c0 = arith.constant 0 : index
    %c0_0 = arith.constant 0 : index
    %c0_1 = arith.constant 0 : index
    %1 = vector.load %arg7[%c0, %c0_0, %c0_1] : memref<10x10x32xf32, #tpu.memory_space<vmem>>, vector<10x10x32xf32>
    tpu.vector_store %arg7[%c0, %c0_0, %c0_1], %0 {strides = array<i32>} : memref<10x10x32xf32, #tpu.memory_space<vmem>>, vector<10x10x32xf32>,
    %cst_2 = arith.constant 0.000000e+00 : f32
    %2 = vector.broadcast %cst_2 : f32 to vector<10x10x32xf32>
    %c0_3 = arith.constant 0 : index
    %c0_4 = arith.constant 0 : index
    %c0_5 = arith.constant 0 : index
    %3 = vector.load %arg8[%c0_3, %c0_4, %c0_5] : memref<10x10x32xf32, #tpu.memory_space<vmem>>, vector<10x10x32xf32>
    tpu.vector_store %arg8[%c0_3, %c0_4, %c0_5], %2 {strides = array<i32>} : memref<10x10x32xf32, #tpu.memory_space<vmem>>, vector<10x10x32xf32>,
    %c0_6 = arith.constant 0 : index
    %c0_7 = arith.constant 0 : index
    %c0_8 = arith.constant 0 : index
    %c0_9 = arith.constant 0 : index
    %4 = vector.load %arg1[%c0_6, %c0_7, %c0_8, %c0_9] : memref<1x8x8x32xf32, #tpu.memory_space<vmem>>, vector<1x8x8x32xf32>
    %5 = vector.shape_cast %4 : vector<1x8x8x32xf32> to vector<8x8x32xf32>
    %c1 = arith.constant 1 : index
    %c1_10 = arith.constant 1 : index
    %c0_11 = arith.constant 0 : index
    %6 = vector.load %arg7[%c1, %c1_10, %c0_11] : memref<10x10x32xf32, #tpu.memory_space<vmem>>, vector<8x8x32xf32>
    tpu.vector_store %arg7[%c1, %c1_10, %c0_11], %5 {strides = array<i32>} : memref<10x10x32xf32, #tpu.memory_space<vmem>>, vector<8x8x32xf32>,
    %c0_12 = arith.constant 0 : index
    %c0_13 = arith.constant 0 : index
    %c0_14 = arith.constant 0 : index
    %c0_15 = arith.constant 0 : index
    %7 = vector.load %arg2[%c0_12, %c0_13, %c0_14, %c0_15] : memref<1x8x8x32xf32, #tpu.memory_space<vmem>>, vector<1x8x8x32xf32>
    %8 = vector.shape_cast %7 : vector<1x8x8x32xf32> to vector<8x8x32xf32>
    %c1_16 = arith.constant 1 : index
    %c1_17 = arith.constant 1 : index
    %c0_18 = arith.constant 0 : index
    %9 = vector.load %arg8[%c1_16, %c1_17, %c0_18] : memref<10x10x32xf32, #tpu.memory_space<vmem>>, vector<8x8x32xf32>
    tpu.vector_store %arg8[%c1_16, %c1_17, %c0_18], %8 {strides = array<i32>} : memref<10x10x32xf32, #tpu.memory_space<vmem>>, vector<8x8x32xf32>,
    %c0_19 = arith.constant 0 : index
    %c0_20 = arith.constant 0 : index
    %10 = vector.load %arg5[%c0_19, %c0_20] : memref<1x128xf32, #tpu.memory_space<vmem>>, vector<1x128xf32>
    %11 = vector.shape_cast %10 : vector<1x128xf32> to vector<1x128xf32>
    %12 = vector.broadcast %11 : vector<1x128xf32> to vector<64x128xf32>
    %c0_21 = arith.constant 0 : index
    %c0_22 = arith.constant 0 : index
    %c0_23 = arith.constant 0 : index
    %13 = vector.load %arg7[%c0_21, %c0_22, %c0_23] : memref<10x10x32xf32, #tpu.memory_space<vmem>>, vector<10x8x32xf32>
    %14 = vector.shape_cast %13 : vector<10x8x32xf32> to vector<80x32xf32>
    %c0_24 = arith.constant 0 : index
    %c0_25 = arith.constant 0 : index
    %c0_26 = arith.constant 0 : index
    %15 = vector.load %arg8[%c0_24, %c0_25, %c0_26] : memref<10x10x32xf32, #tpu.memory_space<vmem>>, vector<10x8x32xf32>
    %16 = vector.shape_cast %15 : vector<10x8x32xf32> to vector<80x32xf32>
    %17 = vector.extract_strided_slice %14 {offsets = [0, 0], sizes = [64, 32], strides = [1, 1]} : vector<80x32xf32> to vector<64x32xf32>
    %18 = vector.extract_strided_slice %16 {offsets = [0, 0], sizes = [64, 32], strides = [1, 1]} : vector<80x32xf32> to vector<64x32xf32>
    %c0_27 = arith.constant 0 : index
    %c0_28 = arith.constant 0 : index
    %c0_29 = arith.constant 0 : index
    %19 = vector.load %arg3[%c0_27, %c0_28, %c0_29] : memref<9x32x128xf32, #tpu.memory_space<vmem>>, vector<1x32x128xf32>
    %20 = vector.shape_cast %19 : vector<1x32x128xf32> to vector<32x128xf32>
    %cst_30 = arith.constant dense<0.000000e+00> : vector<64x128xf32>
    %21 = tpu.matmul %17, %20, %cst_30 {dimension_numbers = #tpu.dot_dimension_numbers<[1], [0], [0], [1], [0, 0, 1, 1], [], []>} : vector<64x32xf32>, vector<32x128xf32>, vector<64x128xf32> -> vector<64x128xf32>
    %22 = arith.addf %12, %21 : vector<64x128xf32>
    %c0_31 = arith.constant 0 : index
    %c0_32 = arith.constant 0 : index
    %c0_33 = arith.constant 0 : index
    %23 = vector.load %arg4[%c0_31, %c0_32, %c0_33] : memref<9x32x128xf32, #tpu.memory_space<vmem>>, vector<1x32x128xf32>
    %24 = vector.shape_cast %23 : vector<1x32x128xf32> to vector<32x128xf32>
    %cst_34 = arith.constant dense<0.000000e+00> : vector<64x128xf32>
    %25 = tpu.matmul %18, %24, %cst_34 {dimension_numbers = #tpu.dot_dimension_numbers<[1], [0], [0], [1], [0, 0, 1, 1], [], []>} : vector<64x32xf32>, vector<32x128xf32>, vector<64x128xf32> -> vector<64x128xf32>
    %26 = arith.addf %22, %25 : vector<64x128xf32>
    %27 = vector.extract_strided_slice %14 {offsets = [8, 0], sizes = [64, 32], strides = [1, 1]} : vector<80x32xf32> to vector<64x32xf32>
    %28 = vector.extract_strided_slice %16 {offsets = [8, 0], sizes = [64, 32], strides = [1, 1]} : vector<80x32xf32> to vector<64x32xf32>
    %c3 = arith.constant 3 : index
    %c0_35 = arith.constant 0 : index
    %c0_36 = arith.constant 0 : index
    %29 = vector.load %arg3[%c3, %c0_35, %c0_36] : memref<9x32x128xf32, #tpu.memory_space<vmem>>, vector<1x32x128xf32>
    %30 = vector.shape_cast %29 : vector<1x32x128xf32> to vector<32x128xf32>
    %cst_37 = arith.constant dense<0.000000e+00> : vector<64x128xf32>
    %31 = tpu.matmul %27, %30, %cst_37 {dimension_numbers = #tpu.dot_dimension_numbers<[1], [0], [0], [1], [0, 0, 1, 1], [], []>} : vector<64x32xf32>, vector<32x128xf32>, vector<64x128xf32> -> vector<64x128xf32>
    %32 = arith.addf %26, %31 : vector<64x128xf32>
    %c3_38 = arith.constant 3 : index
    %c0_39 = arith.constant 0 : index
    %c0_40 = arith.constant 0 : index
    %33 = vector.load %arg4[%c3_38, %c0_39, %c0_40] : memref<9x32x128xf32, #tpu.memory_space<vmem>>, vector<1x32x128xf32>
    %34 = vector.shape_cast %33 : vector<1x32x128xf32> to vector<32x128xf32>
    %cst_41 = arith.constant dense<0.000000e+00> : vector<64x128xf32>
    %35 = tpu.matmul %28, %34, %cst_41 {dimension_numbers = #tpu.dot_dimension_numbers<[1], [0], [0], [1], [0, 0, 1, 1], [], []>} : vector<64x32xf32>, vector<32x128xf32>, vector<64x128xf32> -> vector<64x128xf32>
    %36 = arith.addf %32, %35 : vector<64x128xf32>
    %37 = vector.extract_strided_slice %14 {offsets = [16, 0], sizes = [64, 32], strides = [1, 1]} : vector<80x32xf32> to vector<64x32xf32>
    %38 = vector.extract_strided_slice %16 {offsets = [16, 0], sizes = [64, 32], strides = [1, 1]} : vector<80x32xf32> to vector<64x32xf32>
    %c6 = arith.constant 6 : index
    %c0_42 = arith.constant 0 : index
    %c0_43 = arith.constant 0 : index
    %39 = vector.load %arg3[%c6, %c0_42, %c0_43] : memref<9x32x128xf32, #tpu.memory_space<vmem>>, vector<1x32x128xf32>
    %40 = vector.shape_cast %39 : vector<1x32x128xf32> to vector<32x128xf32>
    %cst_44 = arith.constant dense<0.000000e+00> : vector<64x128xf32>
    %41 = tpu.matmul %37, %40, %cst_44 {dimension_numbers = #tpu.dot_dimension_numbers<[1], [0], [0], [1], [0, 0, 1, 1], [], []>} : vector<64x32xf32>, vector<32x128xf32>, vector<64x128xf32> -> vector<64x128xf32>
    %42 = arith.addf %36, %41 : vector<64x128xf32>
    %c6_45 = arith.constant 6 : index
    %c0_46 = arith.constant 0 : index
    %c0_47 = arith.constant 0 : index
    %43 = vector.load %arg4[%c6_45, %c0_46, %c0_47] : memref<9x32x128xf32, #tpu.memory_space<vmem>>, vector<1x32x128xf32>
    %44 = vector.shape_cast %43 : vector<1x32x128xf32> to vector<32x128xf32>
    %cst_48 = arith.constant dense<0.000000e+00> : vector<64x128xf32>
    %45 = tpu.matmul %38, %44, %cst_48 {dimension_numbers = #tpu.dot_dimension_numbers<[1], [0], [0], [1], [0, 0, 1, 1], [], []>} : vector<64x32xf32>, vector<32x128xf32>, vector<64x128xf32> -> vector<64x128xf32>
    %46 = arith.addf %42, %45 : vector<64x128xf32>
    %c0_49 = arith.constant 0 : index
    %c1_50 = arith.constant 1 : index
    %c0_51 = arith.constant 0 : index
    %47 = vector.load %arg7[%c0_49, %c1_50, %c0_51] : memref<10x10x32xf32, #tpu.memory_space<vmem>>, vector<10x8x32xf32>
    %48 = vector.shape_cast %47 : vector<10x8x32xf32> to vector<80x32xf32>
    %c0_52 = arith.constant 0 : index
    %c1_53 = arith.constant 1 : index
    %c0_54 = arith.constant 0 : index
    %49 = vector.load %arg8[%c0_52, %c1_53, %c0_54] : memref<10x10x32xf32, #tpu.memory_space<vmem>>, vector<10x8x32xf32>
    %50 = vector.shape_cast %49 : vector<10x8x32xf32> to vector<80x32xf32>
    %51 = vector.extract_strided_slice %48 {offsets = [0, 0], sizes = [64, 32], strides = [1, 1]} : vector<80x32xf32> to vector<64x32xf32>
    %52 = vector.extract_strided_slice %50 {offsets = [0, 0], sizes = [64, 32], strides = [1, 1]} : vector<80x32xf32> to vector<64x32xf32>
    %c1_55 = arith.constant 1 : index
    %c0_56 = arith.constant 0 : index
    %c0_57 = arith.constant 0 : index
    %53 = vector.load %arg3[%c1_55, %c0_56, %c0_57] : memref<9x32x128xf32, #tpu.memory_space<vmem>>, vector<1x32x128xf32>
    %54 = vector.shape_cast %53 : vector<1x32x128xf32> to vector<32x128xf32>
    %cst_58 = arith.constant dense<0.000000e+00> : vector<64x128xf32>
    %55 = tpu.matmul %51, %54, %cst_58 {dimension_numbers = #tpu.dot_dimension_numbers<[1], [0], [0], [1], [0, 0, 1, 1], [], []>} : vector<64x32xf32>, vector<32x128xf32>, vector<64x128xf32> -> vector<64x128xf32>
    %56 = arith.addf %46, %55 : vector<64x128xf32>
    %c1_59 = arith.constant 1 : index
    %c0_60 = arith.constant 0 : index
    %c0_61 = arith.constant 0 : index
    %57 = vector.load %arg4[%c1_59, %c0_60, %c0_61] : memref<9x32x128xf32, #tpu.memory_space<vmem>>, vector<1x32x128xf32>
    %58 = vector.shape_cast %57 : vector<1x32x128xf32> to vector<32x128xf32>
    %cst_62 = arith.constant dense<0.000000e+00> : vector<64x128xf32>
    %59 = tpu.matmul %52, %58, %cst_62 {dimension_numbers = #tpu.dot_dimension_numbers<[1], [0], [0], [1], [0, 0, 1, 1], [], []>} : vector<64x32xf32>, vector<32x128xf32>, vector<64x128xf32> -> vector<64x128xf32>
    %60 = arith.addf %56, %59 : vector<64x128xf32>
    %61 = vector.extract_strided_slice %48 {offsets = [8, 0], sizes = [64, 32], strides = [1, 1]} : vector<80x32xf32> to vector<64x32xf32>
    %62 = vector.extract_strided_slice %50 {offsets = [8, 0], sizes = [64, 32], strides = [1, 1]} : vector<80x32xf32> to vector<64x32xf32>
    %c4 = arith.constant 4 : index
    %c0_63 = arith.constant 0 : index
    %c0_64 = arith.constant 0 : index
    %63 = vector.load %arg3[%c4, %c0_63, %c0_64] : memref<9x32x128xf32, #tpu.memory_space<vmem>>, vector<1x32x128xf32>
    %64 = vector.shape_cast %63 : vector<1x32x128xf32> to vector<32x128xf32>
    %cst_65 = arith.constant dense<0.000000e+00> : vector<64x128xf32>
    %65 = tpu.matmul %61, %64, %cst_65 {dimension_numbers = #tpu.dot_dimension_numbers<[1], [0], [0], [1], [0, 0, 1, 1], [], []>} : vector<64x32xf32>, vector<32x128xf32>, vector<64x128xf32> -> vector<64x128xf32>
    %66 = arith.addf %60, %65 : vector<64x128xf32>
    %c4_66 = arith.constant 4 : index
    %c0_67 = arith.constant 0 : index
    %c0_68 = arith.constant 0 : index
    %67 = vector.load %arg4[%c4_66, %c0_67, %c0_68] : memref<9x32x128xf32, #tpu.memory_space<vmem>>, vector<1x32x128xf32>
    %68 = vector.shape_cast %67 : vector<1x32x128xf32> to vector<32x128xf32>
    %cst_69 = arith.constant dense<0.000000e+00> : vector<64x128xf32>
    %69 = tpu.matmul %62, %68, %cst_69 {dimension_numbers = #tpu.dot_dimension_numbers<[1], [0], [0], [1], [0, 0, 1, 1], [], []>} : vector<64x32xf32>, vector<32x128xf32>, vector<64x128xf32> -> vector<64x128xf32>
    %70 = arith.addf %66, %69 : vector<64x128xf32>
    %71 = vector.extract_strided_slice %48 {offsets = [16, 0], sizes = [64, 32], strides = [1, 1]} : vector<80x32xf32> to vector<64x32xf32>
    %72 = vector.extract_strided_slice %50 {offsets = [16, 0], sizes = [64, 32], strides = [1, 1]} : vector<80x32xf32> to vector<64x32xf32>
    %c7 = arith.constant 7 : index
    %c0_70 = arith.constant 0 : index
    %c0_71 = arith.constant 0 : index
    %73 = vector.load %arg3[%c7, %c0_70, %c0_71] : memref<9x32x128xf32, #tpu.memory_space<vmem>>, vector<1x32x128xf32>
    %74 = vector.shape_cast %73 : vector<1x32x128xf32> to vector<32x128xf32>
    %cst_72 = arith.constant dense<0.000000e+00> : vector<64x128xf32>
    %75 = tpu.matmul %71, %74, %cst_72 {dimension_numbers = #tpu.dot_dimension_numbers<[1], [0], [0], [1], [0, 0, 1, 1], [], []>} : vector<64x32xf32>, vector<32x128xf32>, vector<64x128xf32> -> vector<64x128xf32>
    %76 = arith.addf %70, %75 : vector<64x128xf32>
    %c7_73 = arith.constant 7 : index
    %c0_74 = arith.constant 0 : index
    %c0_75 = arith.constant 0 : index
    %77 = vector.load %arg4[%c7_73, %c0_74, %c0_75] : memref<9x32x128xf32, #tpu.memory_space<vmem>>, vector<1x32x128xf32>
    %78 = vector.shape_cast %77 : vector<1x32x128xf32> to vector<32x128xf32>
    %cst_76 = arith.constant dense<0.000000e+00> : vector<64x128xf32>
    %79 = tpu.matmul %72, %78, %cst_76 {dimension_numbers = #tpu.dot_dimension_numbers<[1], [0], [0], [1], [0, 0, 1, 1], [], []>} : vector<64x32xf32>, vector<32x128xf32>, vector<64x128xf32> -> vector<64x128xf32>
    %80 = arith.addf %76, %79 : vector<64x128xf32>
    %c0_77 = arith.constant 0 : index
    %c2 = arith.constant 2 : index
    %c0_78 = arith.constant 0 : index
    %81 = vector.load %arg7[%c0_77, %c2, %c0_78] : memref<10x10x32xf32, #tpu.memory_space<vmem>>, vector<10x8x32xf32>
    %82 = vector.shape_cast %81 : vector<10x8x32xf32> to vector<80x32xf32>
    %c0_79 = arith.constant 0 : index
    %c2_80 = arith.constant 2 : index
    %c0_81 = arith.constant 0 : index
    %83 = vector.load %arg8[%c0_79, %c2_80, %c0_81] : memref<10x10x32xf32, #tpu.memory_space<vmem>>, vector<10x8x32xf32>
    %84 = vector.shape_cast %83 : vector<10x8x32xf32> to vector<80x32xf32>
    %85 = vector.extract_strided_slice %82 {offsets = [0, 0], sizes = [64, 32], strides = [1, 1]} : vector<80x32xf32> to vector<64x32xf32>
    %86 = vector.extract_strided_slice %84 {offsets = [0, 0], sizes = [64, 32], strides = [1, 1]} : vector<80x32xf32> to vector<64x32xf32>
    %c2_82 = arith.constant 2 : index
    %c0_83 = arith.constant 0 : index
    %c0_84 = arith.constant 0 : index
    %87 = vector.load %arg3[%c2_82, %c0_83, %c0_84] : memref<9x32x128xf32, #tpu.memory_space<vmem>>, vector<1x32x128xf32>
    %88 = vector.shape_cast %87 : vector<1x32x128xf32> to vector<32x128xf32>
    %cst_85 = arith.constant dense<0.000000e+00> : vector<64x128xf32>
    %89 = tpu.matmul %85, %88, %cst_85 {dimension_numbers = #tpu.dot_dimension_numbers<[1], [0], [0], [1], [0, 0, 1, 1], [], []>} : vector<64x32xf32>, vector<32x128xf32>, vector<64x128xf32> -> vector<64x128xf32>
    %90 = arith.addf %80, %89 : vector<64x128xf32>
    %c2_86 = arith.constant 2 : index
    %c0_87 = arith.constant 0 : index
    %c0_88 = arith.constant 0 : index
    %91 = vector.load %arg4[%c2_86, %c0_87, %c0_88] : memref<9x32x128xf32, #tpu.memory_space<vmem>>, vector<1x32x128xf32>
    %92 = vector.shape_cast %91 : vector<1x32x128xf32> to vector<32x128xf32>
    %cst_89 = arith.constant dense<0.000000e+00> : vector<64x128xf32>
    %93 = tpu.matmul %86, %92, %cst_89 {dimension_numbers = #tpu.dot_dimension_numbers<[1], [0], [0], [1], [0, 0, 1, 1], [], []>} : vector<64x32xf32>, vector<32x128xf32>, vector<64x128xf32> -> vector<64x128xf32>
    %94 = arith.addf %90, %93 : vector<64x128xf32>
    %95 = vector.extract_strided_slice %82 {offsets = [8, 0], sizes = [64, 32], strides = [1, 1]} : vector<80x32xf32> to vector<64x32xf32>
    %96 = vector.extract_strided_slice %84 {offsets = [8, 0], sizes = [64, 32], strides = [1, 1]} : vector<80x32xf32> to vector<64x32xf32>
    %c5 = arith.constant 5 : index
    %c0_90 = arith.constant 0 : index
    %c0_91 = arith.constant 0 : index
    %97 = vector.load %arg3[%c5, %c0_90, %c0_91] : memref<9x32x128xf32, #tpu.memory_space<vmem>>, vector<1x32x128xf32>
    %98 = vector.shape_cast %97 : vector<1x32x128xf32> to vector<32x128xf32>
    %cst_92 = arith.constant dense<0.000000e+00> : vector<64x128xf32>
    %99 = tpu.matmul %95, %98, %cst_92 {dimension_numbers = #tpu.dot_dimension_numbers<[1], [0], [0], [1], [0, 0, 1, 1], [], []>} : vector<64x32xf32>, vector<32x128xf32>, vector<64x128xf32> -> vector<64x128xf32>
    %100 = arith.addf %94, %99 : vector<64x128xf32>
    %c5_93 = arith.constant 5 : index
    %c0_94 = arith.constant 0 : index
    %c0_95 = arith.constant 0 : index
    %101 = vector.load %arg4[%c5_93, %c0_94, %c0_95] : memref<9x32x128xf32, #tpu.memory_space<vmem>>, vector<1x32x128xf32>
    %102 = vector.shape_cast %101 : vector<1x32x128xf32> to vector<32x128xf32>
    %cst_96 = arith.constant dense<0.000000e+00> : vector<64x128xf32>
    %103 = tpu.matmul %96, %102, %cst_96 {dimension_numbers = #tpu.dot_dimension_numbers<[1], [0], [0], [1], [0, 0, 1, 1], [], []>} : vector<64x32xf32>, vector<32x128xf32>, vector<64x128xf32> -> vector<64x128xf32>
    %104 = arith.addf %100, %103 : vector<64x128xf32>
    %105 = vector.extract_strided_slice %82 {offsets = [16, 0], sizes = [64, 32], strides = [1, 1]} : vector<80x32xf32> to vector<64x32xf32>
    %106 = vector.extract_strided_slice %84 {offsets = [16, 0], sizes = [64, 32], strides = [1, 1]} : vector<80x32xf32> to vector<64x32xf32>
    %c8 = arith.constant 8 : index
    %c0_97 = arith.constant 0 : index
    %c0_98 = arith.constant 0 : index
    %107 = vector.load %arg3[%c8, %c0_97, %c0_98] : memref<9x32x128xf32, #tpu.memory_space<vmem>>, vector<1x32x128xf32>
    %108 = vector.shape_cast %107 : vector<1x32x128xf32> to vector<32x128xf32>
    %cst_99 = arith.constant dense<0.000000e+00> : vector<64x128xf32>
    %109 = tpu.matmul %105, %108, %cst_99 {dimension_numbers = #tpu.dot_dimension_numbers<[1], [0], [0], [1], [0, 0, 1, 1], [], []>} : vector<64x32xf32>, vector<32x128xf32>, vector<64x128xf32> -> vector<64x128xf32>
    %110 = arith.addf %104, %109 : vector<64x128xf32>
    %c8_100 = arith.constant 8 : index
    %c0_101 = arith.constant 0 : index
    %c0_102 = arith.constant 0 : index
    %111 = vector.load %arg4[%c8_100, %c0_101, %c0_102] : memref<9x32x128xf32, #tpu.memory_space<vmem>>, vector<1x32x128xf32>
    %112 = vector.shape_cast %111 : vector<1x32x128xf32> to vector<32x128xf32>
    %cst_103 = arith.constant dense<0.000000e+00> : vector<64x128xf32>
    %113 = tpu.matmul %106, %112, %cst_103 {dimension_numbers = #tpu.dot_dimension_numbers<[1], [0], [0], [1], [0, 0, 1, 1], [], []>} : vector<64x32xf32>, vector<32x128xf32>, vector<64x128xf32> -> vector<64x128xf32>
    %114 = arith.addf %110, %113 : vector<64x128xf32>
    %c0_104 = arith.constant 0 : index
    %c0_105 = arith.constant 0 : index
    %c0_106 = arith.constant 0 : index
    %115 = vector.load %arg6[%c0_104, %c0_105, %c0_106] : memref<1x64x128xf32, #tpu.memory_space<vmem>>, vector<1x64x128xf32>
    %116 = vector.shape_cast %115 : vector<1x64x128xf32> to vector<64x128xf32>
    %117 = vector.shape_cast %114 : vector<64x128xf32> to vector<1x64x128xf32>
    tpu.vector_store %arg6[%c0_104, %c0_105, %c0_106], %117 {strides = array<i32>} : memref<1x64x128xf32, #tpu.memory_space<vmem>>, vector<1x64x128xf32>,
    return
  }
  func.func @transform_0(%arg0: i32) -> (i32, i32, i32, i32) {
    %c0_i32 = arith.constant 0 : i32
    %c0_i32_0 = arith.constant 0 : i32
    %c0_i32_1 = arith.constant 0 : i32
    %c0_i32_2 = arith.constant 0 : i32
    return %arg0, %c0_i32, %c0_i32_0, %c0_i32_1 : i32, i32, i32, i32
  }
  func.func @transform_1(%arg0: i32) -> (i32, i32, i32, i32) {
    %c0_i32 = arith.constant 0 : i32
    %c0_i32_0 = arith.constant 0 : i32
    %c0_i32_1 = arith.constant 0 : i32
    %c0_i32_2 = arith.constant 0 : i32
    return %arg0, %c0_i32, %c0_i32_0, %c0_i32_1 : i32, i32, i32, i32
  }
  func.func @transform_2(%arg0: i32) -> (i32, i32, i32) {
    %c0_i32 = arith.constant 0 : i32
    %c0_i32_0 = arith.constant 0 : i32
    %c0_i32_1 = arith.constant 0 : i32
    %c0_i32_2 = arith.constant 0 : i32
    return %c0_i32, %c0_i32_0, %c0_i32_1 : i32, i32, i32
  }
  func.func @transform_3(%arg0: i32) -> (i32, i32, i32) {
    %c0_i32 = arith.constant 0 : i32
    %c0_i32_0 = arith.constant 0 : i32
    %c0_i32_1 = arith.constant 0 : i32
    %c0_i32_2 = arith.constant 0 : i32
    return %c0_i32, %c0_i32_0, %c0_i32_1 : i32, i32, i32
  }
  func.func @transform_4(%arg0: i32) -> (i32, i32) {
    %c0_i32 = arith.constant 0 : i32
    %c0_i32_0 = arith.constant 0 : i32
    %c0_i32_1 = arith.constant 0 : i32
    return %c0_i32, %c0_i32_0 : i32, i32
  }
  func.func @transform_5(%arg0: i32) -> (i32, i32, i32) {
    %c0_i32 = arith.constant 0 : i32
    %c0_i32_0 = arith.constant 0 : i32
    %c0_i32_1 = arith.constant 0 : i32
    return %arg0, %c0_i32, %c0_i32_0 : i32, i32, i32
  }
}

</mosaic_0001>

<bundles_post_ra>
// kernel: tpu_custom_call.1
= control target key start
LH: loop header
LB: loop body
LE: loop exit
PB: predicated region body
PF: predicated region fallthrough
CT: control target
= control target key end

     0   :  { %s4758_s0 = inlined_call_operand.hbm [shape: f32[2,8,8,32], index: 0, kind: input, shape index: {}]   ;;  %s4759_s1 = inlined_call_operand.hbm [shape: f32[2,8,8,32], index: 1, kind: input, shape index: {}]   ;;  %s4760_s2 = inlined_call_operand.hbm [shape: f32[9,32,128], index: 2, kind: input, shape index: {}]   ;;  %s4761_s3 = inlined_call_operand.hbm [shape: f32[9,32,128], index: 3, kind: input, shape index: {}]   ;;  %s4762_s4 = inlined_call_operand.vmem [shape: f32[1,128], index: 4, kind: input, shape index: {}]   ;;  %s4763_s5 = inlined_call_operand.hbm [shape: f32[2,64,128], index: 5, kind: output, shape index: {}]  }
   0x1   :  { %4771 = sst [smem:[#allocation28_spill]] %s4758_s0 }
   0x2   :  { %4772 = sst [smem:[#allocation29_spill]] %s4760_s2 }
   0x3   :  { %10 = vsyncpa [#allocation5], 0 }
   0x4   :  { %12 = vsyncpa [#allocation5 + $0x1], 0 }
   0x5   :  { %13 = vsyncpa [#allocation8], 0 }
   0x6   :  { %15 = vsyncpa [#allocation8 + $0x1], 0 }
   0x7   :  { %16 = vsyncpa [#allocation11], 0 }
   0x8   :  { %17 = vsyncpa [#allocation6], 0 }
   0x9   :  { %19 = vsyncpa [#allocation6 + $0x1], 0  ;;  %s3943_s18 = smov 0   ;;  %s3945_s19 = smov 0  }
   0xa   :  { %s3947_s20 = smov 0   ;;  %s3949_s21 = smov 0  }
   0xb LB: > { %s3964_s22 = sadd.s32 4294967295, %s3901_s21   ;;  %s2894_s23 = sadd.s32 4294967294, %s3901_s21   ;;  %s3901_s21 = sphi %s3949_s21, %s4814_s21   ;;  %s3897_s20 = sphi %s3947_s20, %s4813_s20   ;;  %s3893_s19 = sphi %s3945_s19, %s4812_s19   ;;  %s3889_s18 = sphi %s3943_s18, %s4811_s18  }
   0xc   : > { %p45_p0 = scmp.ne.s32.totalorder %s3893_s19, %s3889_s18  ;;  %p4768_p1 = scmp.eq.s32.totalorder %s3964_s22, 0 }
   0xd   : > { %p158_p2 = scmp.eq.s32.totalorder %s3964_s22, 1  ;;  %p164_p3 = scmp.eq.s32.totalorder %s2894_s23, 1 }
   0xe   : > { %p3973_p4 = por %p4768_p1, %p45_p0  ;;  %p2895_p5 = scmp.ge.s32.totalorder %s3901_s21, 1 }
   0xf   : > { %p3978_p6 = por %p164_p3, %p45_p0  ;;  %p171_p7 = scmp.lt.s32.totalorder %s3901_s21, 3 }
  0x10   : > { %s4773_s24 = scalar_select %p3973_p4, 1, 0 }
  0x11   : > { %s4774_s25 = scalar_select %p3978_p6, 1, 0 }
  0x12   : > { %p3983_p8 = pnand %p2895_p5, %p171_p7  ;;  %s3903_s27 = smov [#allocation9]  }
  0x13   : > { %s183_s28 = sshll.u32 %s3903_s27, 4  ;;  %s3904_s30 = smov [#allocation10]   ;;  %s184_s28 = int_to_ptr.vmem [resolvable:$true] %s183_s28 }
  0x14   : > { %p3654_p9 = pneg %p3983_p8  ;;  %s196_s6 = sshll.u32 %s3904_s30, 4  ;;  %s197_s6 = int_to_ptr.vmem [resolvable:$true] %s196_s6 }
  0x15   : > { %s3728_s7 = scalar_lea.vmem %s184_s28, 4608  ;;  %p3736_p5 = scmp.lt.s32.totalorder %s184_s28, %s184_s28 }
  0x16   : > { %p3992_p11 = pnand %p3654_p9, %p4768_p1  ;;  %p3729_p13 = scmp.ne.s32.totalorder %s184_s28, %s3728_s7 }
  0x17   : > { %p3737_p7 = scmp.lt.s32.totalorder %s3728_s7, %s3728_s7 }
  0x18   : > { %p3719_p12 = pneg %p3992_p11 }
  0x19   : > { %p3738_p10 = por %p3737_p7, %p3736_p5 }
  0x1a   : > { %p3731_p0 = pnand %p3729_p13, %p3719_p12 }
  0x1c   : > { %p3732_p3 = pneg %p3731_p0 }
  0x1e   : > { %p3739_p9 = pnand %p3738_p10, %p3732_p3 }
  0x20   : > { %3742 = shalt.err (!%p3739_p9)
}
  0x21   : > { %s4764_s8 = smov 128   ;;  %s4766_s9 = smov 8  }
  0x22   : > { %s4777_s2 = sld [smem:[#allocation29_spill]]  ;;  %s3754_s12 = scalar_lea.vmem %s197_s6, 4608 }
  0x23   : > { %p3755_p13 = scmp.ne.s32.totalorder %s197_s6, %s3754_s12  ;;  %p3762_p10 = scmp.lt.s32.totalorder %s197_s6, %s197_s6 }
  0x24   : > { %p3763_p3 = scmp.lt.s32.totalorder %s3754_s12, %s3754_s12 }
  0x25   : > { %p3757_p0 = pnand %p3755_p13, %p3719_p12 }
  0x26   : > { %p3764_p7 = por %p3763_p3, %p3762_p10 }
  0x27   : > { %p3758_p5 = pneg %p3757_p0 }
  0x28   : > { %3657 = dma.hbm_to_vmem [thread:$0]  (!%p3992_p11), %s4777_s2, 4608, %s184_s28, [#allocation8], %s4764_s8, %s4764_s8, %s4766_s9  }
  0x29   : > { %p3765_p9 = pnand %p3764_p7, %p3758_p5 }
  0x2b   : > { %3768 = shalt.err (!%p3765_p9)
}
  0x2c   : > { %3660 = dma.hbm_to_vmem [thread:$0]  (!%p3992_p11), %s4761_s3, 4608, %s197_s6, [#allocation11], %s4764_s8, %s4764_s8, %s4766_s9  }
  0x2d   : > { %s4021_s15 = sadd.s32 1, %s3901_s21   ;;  %s32_s16 = sadd.s32 1, %s3897_s20 }
  0x2e   : > { %s29_s17 = ssub.s32 %s3901_s21, %s4021_s15  ;;  %p39_p12 = scmp.ne.s32.totalorder %s3897_s20, %s3893_s19 }
  0x2f   : > { %p30_p13 = scmp.eq.s32.totalorder %s29_s17, 0  ;;  %p40_p0 = scmp.eq.s32.totalorder %s3901_s21, 0 }
  0x30   : > { %p4031_p5 = por %p158_p2, %p39_p12  ;;  %p3674_p10 = scmp.lt.s32.totalorder %s3901_s21, 2 }
  0x31   : > { %s4037_s27 = scalar_select %p30_p13, %s3897_s20, %s32_s16  }
  0x32   : > { %s4778_s23 = scalar_select %p4031_p5, 1, 0 }
  0x33   : > { %p41_p3 = por %p40_p0, %p39_p12  ;;  %s213_s28 = sand.u32 1, %s3897_s20  }
  0x34   : > { %s2899_s29 = sshll.u32 %s213_s28, 6  ;;  %s3061_s30 = sshll.u32 %s3901_s21, 10 }
  0x35   : > { %s4779_s0 = sld [smem:[#allocation28_spill]]  ;;  %s217_s11 = scalar_lea.vmem [#allocation4], %s2899_s29 }
  0x36   : > { %s224_s12 = sshll.u32 %s217_s11, 4  ;;  %p4048_p2 = pnand %p3674_p10, %p41_p3  ;;  %s4046_s12 = int_to_ptr.vmem [resolvable:$true] %s224_s12 }
  0x37   : > { %s4055_s17 = scalar_lea.hbm %s4759_s1, %s3061_s30  ;;  %s238_s6 = scalar_lea.vmem [#allocation7], %s2899_s29 }
  0x38   : > { %s4057_s7 = sshll.u32 %s238_s6, 4  ;;  %s4059_s8 = scalar_lea.sflag [#allocation5], %s213_s28  ;;  %s4090_s7 = int_to_ptr.vmem [resolvable:$true] %s4057_s7 }
  0x39   : > { %p3771_p7 = pneg %p4048_p2 }
  0x3b   : > { %s4044_s10 = scalar_lea.hbm %s4779_s0, %s3061_s30  ;;  %s3774_s14 = scalar_lea.hbm %s4779_s0, 2048 }
  0x3c   : > { %s3769_s9 = scalar_lea.hbm %s4044_s10, 1024  ;;  %p3775_p13 = scmp.lt.s32.totalorder %s4044_s10, %s4779_s0 }
  0x3d   : > { %p3770_p11 = scmp.ne.s32.totalorder %s4044_s10, %s3769_s9  ;;  %p3776_p0 = scmp.lt.s32.totalorder %s3774_s14, %s3769_s9 }
  0x3f   : > { %p3772_p9 = pnand %p3771_p7, %p3770_p11  ;;  %p3777_p10 = por %p3776_p0, %p3775_p13 }
  0x41   : > { %p3773_p12 = pneg %p3772_p9 }
  0x43   : > { %p3778_p3 = pnand %p3777_p10, %p3773_p12 }
  0x45   : > { %3781 = shalt.err (!%p3778_p3)
}
  0x46   : > { %s3782_s28 = scalar_lea.vmem %s4046_s12, 1024  ;;  %s3907_s2 = smov [#allocation4]  }
  0x47   : > { %p3783_p1 = scmp.ne.s32.totalorder %s4046_s12, %s3782_s28  ;;  %s3787_s29 = sshll.u32 %s3907_s2, 4  ;;  %s3788_s29 = int_to_ptr.vmem [resolvable:$false] %s3787_s29 }
  0x48   : > { %s3789_s6 = scalar_lea.vmem %s3788_s29, 2048  ;;  %p3790_p6 = scmp.lt.s32.totalorder %s4046_s12, %s3788_s29 }
  0x49   : > { %p3785_p11 = pnand %p3783_p1, %p3771_p7  ;;  %p3791_p5 = scmp.lt.s32.totalorder %s3789_s6, %s3782_s28 }
  0x4b   : > { %p3786_p9 = pneg %p3785_p11  ;;  %p3792_p4 = por %p3791_p5, %p3790_p6 }
  0x4d   : > { %p3793_p13 = pnand %p3792_p4, %p3786_p9 }
  0x4f   : > { %3796 = shalt.err (!%p3793_p13)
}
  0x50   : > { %s4781_s9 = smov 8   ;;  %s4782_s11 = smov 128  }
  0x51   : > { %3664 = dma.hbm_to_vmem [thread:$0]  (!%p4048_p2), %s4044_s10, 1024, %s4046_s12, %s4059_s8, %s4782_s11, %s4782_s11, %s4781_s9  }
  0x52   : > { %s234_s14 = sand.u32 1, %s3901_s21   ;;  %s3797_s30 = scalar_lea.hbm %s4055_s17, 1024 }
  0x53   : > { %s235_s16 = scalar_lea.sflag [#allocation8], %s234_s14  ;;  %p3798_p1 = scmp.ne.s32.totalorder %s4055_s17, %s3797_s30 }
  0x54   : > { %s3802_s29 = scalar_lea.hbm %s4759_s1, 2048  ;;  %p3803_p5 = scmp.lt.s32.totalorder %s4055_s17, %s4759_s1 }
  0x55   : > { %p3800_p4 = pnand %p3798_p1, %p3771_p7  ;;  %p3804_p12 = scmp.lt.s32.totalorder %s3802_s29, %s3797_s30 }
  0x57   : > { %p3801_p6 = pneg %p3800_p4  ;;  %p3805_p0 = por %p3804_p12, %p3803_p5 }
  0x59   : > { %p3806_p10 = pnand %p3805_p0, %p3801_p6 }
  0x5b   : > { %3809 = shalt.err (!%p3806_p10)
}
  0x5c   : > { %s3810_s8 = scalar_lea.vmem %s4090_s7, 1024  ;;  %s3908_s10 = smov [#allocation7]  }
  0x5d   : > { %p3811_p3 = scmp.ne.s32.totalorder %s4090_s7, %s3810_s8  ;;  %s3815_s12 = sshll.u32 %s3908_s10, 4  ;;  %s3816_s12 = int_to_ptr.vmem [resolvable:$false] %s3815_s12 }
  0x5e   : > { %s3817_s14 = scalar_lea.vmem %s3816_s12, 2048  ;;  %p3818_p13 = scmp.lt.s32.totalorder %s4090_s7, %s3816_s12 }
  0x5f   : > { %p3813_p11 = pnand %p3811_p3, %p3771_p7  ;;  %p3819_p1 = scmp.lt.s32.totalorder %s3817_s14, %s3810_s8 }
  0x61   : > { %p3814_p9 = pneg %p3813_p11  ;;  %p3820_p4 = por %p3819_p1, %p3818_p13 }
  0x63   : > { %p3821_p5 = pnand %p3820_p4, %p3814_p9 }
  0x65   : > { %3824 = shalt.err (!%p3821_p5)
}
  0x66   : > { %3667 = dma.hbm_to_vmem [thread:$0]  (!%p4048_p2), %s4055_s17, 1024, %s4090_s7, %s235_s16, %s4782_s11, %s4782_s11, %s4781_s9  }
  0x67   : > { %257 = sbr.rel (%p3983_p8) target bundleno = 504 (0x1f8), region = 40 }
  0x6c   : > { %s4121_s0 = sand.u32 1, %s3893_s19   ;;  %p4783_p7 = scmp.ne.s32.totalorder %s4773_s24, 0 }
  0x6d   : > { %s4124_s30 = sshll.u32 %s4121_s0, 6  ;;  %s260_s28 = scalar_lea.sflag [#allocation5], %s4121_s0 }
  0x6e   : > { %s4128_s13 = scalar_lea.vmem [#allocation4], %s4124_s30 }
  0x6f   : > { %3868 = dma.done.wait (%p4783_p7), %s260_s28, 1024  }
  0x70   : > { %3870 = vsyncadd (%p4783_p7), %s260_s28, 4294966272  ;;  %s268_s26 = sand.u32 1, %s3964_s22   ;;  %s4136_s7 = scalar_lea.vmem [#allocation7], %s4124_s30 }
  0x71   : > { %s269_s17 = scalar_lea.sflag [#allocation8], %s268_s26 }
  0x72   : > { %3872 = dma.done.wait (%p4783_p7), %s269_s17, 1024  }
  0x73   : > { %3874 = vsyncadd (%p4783_p7), %s269_s17, 4294966272  ;;  %p4784_p8 = scmp.eq.s32.totalorder %s3964_s22, 0 }
  0x75   : > { %3876 = dma.done.wait (%p4784_p8), [#allocation8], 4608   ;;  %p4785_p2 = pmov %p4784_p8 }
  0x77   : > { %3878 = vsyncadd (%p4785_p2), [#allocation8], 4294962688  ;;  %p4786_p6 = pmov %p4785_p2 }
  0x78   : > { %p4787_p12 = pmov %p4785_p2 }
  0x79   : > { %3880 = dma.done.wait (%p4786_p6), [#allocation11], 4608  }
  0x7a   : > { %3882 = vsyncadd (%p4787_p12), [#allocation11], 4294962688  ;;  %vm312_vm0 = vcmask 261120   ;;  %vm314_vm1 = vcmask 254976   ;;  %v3909_v0 = vmov 0.0   ;;  %v418_v1 = vld [vmem:[#allocation9 + $0x18] sm:$0xff] }
  0x7b   : > { %313 = vst.msk [vmem:[#allocation2] sm:$0xff] %vm312_vm0, %v3909_v0  ;;  %316 = vst.msk [vmem:[#allocation2 + $0x10] sm:$0xff] %vm312_vm0, %v3909_v0  ;;  %v559_v2 = vld [vmem:[#allocation10 + $0x18] sm:$0xff]  ;;  %v417_v3 = vld [vmem:[#allocation9 + $0x10] sm:$0xff]  ;;  %3280 = vmatprep.subr.mxu0 %v418_v1  ;;  %s4697_s11 = scalar_lea.vmem [#allocation12], %s4124_s30  ;;  %s3063_s2 = sshll.u32 %s3964_s22, 10 }
  0x7c   : > { %318 = vst.msk [vmem:[#allocation2 + $0x20] sm:$0xff] %vm312_vm0, %v3909_v0  ;;  %320 = vst.msk [vmem:[#allocation2 + $0x30] sm:$0xff] %vm312_vm0, %v3909_v0  ;;  %3300 = vmatprep.subr.mxu1 %v559_v2  ;;  %v558_v4 = vld [vmem:[#allocation10 + $0x10] sm:$0xff]  ;;  %3281 = vmatpush3.msra.mxu0 %v418_v1  ;;  %v416_v5 = vld [vmem:[#allocation9 + $0x8] sm:$0xff]  ;;  %s2779_s16 = sshll.u32 %s4697_s11, 4  ;;  %s4713_s8 = scalar_lea.hbm %s4763_s5, %s3063_s2  ;;  %s4707_s16 = int_to_ptr.vmem [resolvable:$true] %s2779_s16 }
  0x7d   : > { %322 = vst.msk [vmem:[#allocation2 + $0x40] sm:$0xff] %vm312_vm0, %v3909_v0  ;;  %324 = vst.msk [vmem:[#allocation2 + $0x50] sm:$0xff] %vm312_vm0, %v3909_v0  ;;  %3301 = vmatpush3.msra.mxu1 %v559_v2  ;;  %v557_v6 = vld [vmem:[#allocation10 + $0x8] sm:$0xff]  ;;  %3282 = vmatprep.subr.mxu0 %v417_v3  ;;  %v415_v7 = vld [vmem:[#allocation9] sm:$0xff]  ;;  %s2766_s10 = scalar_lea.sflag [#allocation6], %s4121_s0  ;;  %s3825_s22 = scalar_lea.vmem %s4707_s16, 1024 }
  0x7e   : > { %326 = vst.msk [vmem:[#allocation2 + $0x60] sm:$0xff] %vm312_vm0, %v3909_v0  ;;  %328 = vst.msk [vmem:[#allocation2 + $0x70] sm:$0xff] %vm312_vm0, %v3909_v0  ;;  %3302 = vmatprep.subr.mxu1 %v558_v4  ;;  %v354_v9 = vld [vmem:[%s4128_s13] sm:$0xff]  ;;  %3283 = vmatpush3.msra.mxu0 %v417_v3  ;;  %v355_v12 = vld [vmem:[%s4128_s13 + $0x8] sm:$0xff]  ;;  %p3826_p0 = scmp.ne.s32.totalorder %s4707_s16, %s3825_s22  ;;  %p4808_p10 = scmp.ne.s32.totalorder %s4778_s23, 0 }
  0x7f   : > { %330 = vst.msk [vmem:[#allocation2 + $0x80] sm:$0xff] %vm312_vm0, %v3909_v0  ;;  %332 = vst.msk [vmem:[#allocation2 + $0x90] sm:$0xff] %vm312_vm0, %v3909_v0  ;;  %3303 = vmatpush3.msra.mxu1 %v558_v4  ;;  %v556_v10 = vld [vmem:[#allocation10] sm:$0xff]  ;;  %3284 = vmatprep.subr.mxu0 %v416_v5  ;;  %v356_v14 = vld [vmem:[%s4128_s13 + $0x10] sm:$0xff]  ;;  %s3910_s12 = smov [#allocation12]  }
  0x80   : > { %334 = vst.msk [vmem:[#allocation3] sm:$0xff] %vm312_vm0, %v3909_v0  ;;  %336 = vst.msk [vmem:[#allocation3 + $0x10] sm:$0xff] %vm312_vm0, %v3909_v0  ;;  %v371_v11 = vld [vmem:[%s4136_s7] sm:$0xff]  ;;  %3304 = vmatprep.subr.mxu1 %v557_v6  ;;  %v372_v15 = vld [vmem:[%s4136_s7 + $0x8] sm:$0xff]  ;;  %3285 = vmatpush3.msra.mxu0 %v416_v5  ;;  %p3827_p3 = pnand %p3826_p0, %p4808_p10  ;;  %s3829_s14 = sshll.u32 %s3910_s12, 4  ;;  %s3830_s14 = int_to_ptr.vmem [resolvable:$false] %s3829_s14 }
  0x81   : > { %338 = vst.msk [vmem:[#allocation3 + $0x20] sm:$0xff] %vm312_vm0, %v3909_v0  ;;  %340 = vst.msk [vmem:[#allocation3 + $0x30] sm:$0xff] %vm312_vm0, %v3909_v0  ;;  %3305 = vmatpush3.msra.mxu1 %v557_v6  ;;  %v701_v16 = vld [vmem:[#allocation9 + $0x78] sm:$0xff]  ;;  %v373_v17 = vld [vmem:[%s4136_s7 + $0x10] sm:$0xff]  ;;  %3286 = vmatprep.subr.mxu0 %v415_v7  ;;  %s3831_s30 = scalar_lea.vmem %s3830_s14, 2048  ;;  %p3832_p9 = scmp.lt.s32.totalorder %s4707_s16, %s3830_s14 }
  0x82   : > { %342 = vst.msk [vmem:[#allocation3 + $0x40] sm:$0xff] %vm312_vm0, %v3909_v0  ;;  %344 = vst.msk [vmem:[#allocation3 + $0x50] sm:$0xff] %vm312_vm0, %v3909_v0  ;;  %v395_v8 = vld [vmem:[#allocation2] sm:$0xff]  ;;  %v357_v18 = vld [vmem:[%s4128_s13 + $0x18] sm:$0xff]  ;;  %3287 = vmatpush3.msra.mxu0 %v415_v7  ;;  %3306 = vmatprep.subr.mxu1 %v556_v10  ;;  %p3828_p11 = pneg %p3827_p3  ;;  %p3833_p13 = scmp.lt.s32.totalorder %s3831_s30, %s3825_s22 }
  0x83   : > { %346 = vst.msk [vmem:[#allocation3 + $0x60] sm:$0xff] %vm312_vm0, %v3909_v0  ;;  %348 = vst.msk [vmem:[#allocation3 + $0x70] sm:$0xff] %vm312_vm0, %v3909_v0  ;;  %3288 = vmatprep.mubr.msk.f32.mxu0 %vm312_vm0, %v395_v8  ;;  %v822_v19 = vld [vmem:[#allocation10 + $0x78] sm:$0xff]  ;;  %v358_v20 = vld [vmem:[%s4128_s13 + $0x20] sm:$0xff]  ;;  %3307 = vmatpush3.msra.mxu1 %v556_v10 }
  0x84   : > { %350 = vst.msk [vmem:[#allocation3 + $0x80] sm:$0xff] %vm312_vm0, %v3909_v0  ;;  %352 = vst.msk [vmem:[#allocation3 + $0x90] sm:$0xff] %vm312_vm0, %v3909_v0  ;;  %v374_v21 = vld [vmem:[%s4136_s7 + $0x18] sm:$0xff]  ;;  %v375_v22 = vld [vmem:[%s4136_s7 + $0x20] sm:$0xff]  ;;  %3320 = vmatprep.subr.mxu0 %v701_v16  ;;  %3340 = vmatprep.subr.mxu1 %v822_v19  ;;  %p3834_p1 = por %p3833_p13, %p3832_p9 }
  0x85   : > { %317 = vst.msk [vmem:[#allocation2 + $0x18] sm:$0x3] %vm314_vm1, %v3909_v0  ;;  %315 = vst.msk [vmem:[#allocation2 + $0x8] sm:$0x3] %vm314_vm1, %v3909_v0  ;;  %v359_v23 = vld [vmem:[%s4128_s13 + $0x28] sm:$0xff]  ;;  %v360_v24 = vld [vmem:[%s4128_s13 + $0x30] sm:$0xff] }
  0x86   : > { %319 = vst.msk [vmem:[#allocation2 + $0x28] sm:$0x3] %vm314_vm1, %v3909_v0  ;;  %321 = vst.msk [vmem:[#allocation2 + $0x38] sm:$0x3] %vm314_vm1, %v3909_v0  ;;  %v376_v25 = vld [vmem:[%s4136_s7 + $0x28] sm:$0xff]  ;;  %v377_v26 = vld [vmem:[%s4136_s7 + $0x30] sm:$0xff]  ;;  %p3835_p4 = pnand %p3834_p1, %p3828_p11 }
  0x87   : > { %323 = vst.msk [vmem:[#allocation2 + $0x48] sm:$0x3] %vm314_vm1, %v3909_v0  ;;  %325 = vst.msk [vmem:[#allocation2 + $0x58] sm:$0x3] %vm314_vm1, %v3909_v0  ;;  %v405_v13 = vld [vmem:[#allocation3] sm:$0xff]  ;;  %v700_v30 = vld [vmem:[#allocation9 + $0x70] sm:$0xff] }
  0x88   : > { %327 = vst.msk [vmem:[#allocation2 + $0x68] sm:$0x3] %vm314_vm1, %v3909_v0  ;;  %329 = vst.msk [vmem:[#allocation2 + $0x78] sm:$0x3] %vm314_vm1, %v3909_v0  ;;  %3308 = vmatprep.mubr.msk.f32.mxu1 %vm312_vm0, %v405_v13  ;;  %v821_v33 = vld [vmem:[#allocation10 + $0x70] sm:$0xff]  ;;  %v361_v36 = vld [vmem:[%s4128_s13 + $0x38] sm:$0xff] }
  0x89   : > { %331 = vst.msk [vmem:[#allocation2 + $0x88] sm:$0x3] %vm314_vm1, %v3909_v0  ;;  %333 = vst.msk [vmem:[#allocation2 + $0x98] sm:$0x3] %vm314_vm1, %v3909_v0  ;;  %v699_v38 = vld [vmem:[#allocation9 + $0x68] sm:$0xff]  ;;  %v378_v41 = vld [vmem:[%s4136_s7 + $0x38] sm:$0xff] }
  0x8a   : > { %335 = vst.msk [vmem:[#allocation3 + $0x8] sm:$0x3] %vm314_vm1, %v3909_v0  ;;  %337 = vst.msk [vmem:[#allocation3 + $0x18] sm:$0x3] %vm314_vm1, %v3909_v0  ;;  %v820_v40 = vld [vmem:[#allocation10 + $0x68] sm:$0xff]  ;;  %v698_v45 = vld [vmem:[#allocation9 + $0x60] sm:$0xff] }
  0x8b   : > { %339 = vst.msk [vmem:[#allocation3 + $0x28] sm:$0x3] %vm314_vm1, %v3909_v0  ;;  %341 = vst.msk [vmem:[#allocation3 + $0x38] sm:$0x3] %vm314_vm1, %v3909_v0  ;;  %v819_v47 = vld [vmem:[#allocation10 + $0x60] sm:$0xff]  ;;  %v943_v49 = vld [vmem:[#allocation9 + $0xd8] sm:$0xff] }
  0x8c   : > { %343 = vst.msk [vmem:[#allocation3 + $0x48] sm:$0x3] %vm314_vm1, %v3909_v0  ;;  %345 = vst.msk [vmem:[#allocation3 + $0x58] sm:$0x3] %vm314_vm1, %v3909_v0  ;;  %v1064_v50 = vld [vmem:[#allocation10 + $0xd8] sm:$0xff]  ;;  %v942_v51 = vld [vmem:[#allocation9 + $0xd0] sm:$0xff] }
  0x8d   : > { %347 = vst.msk [vmem:[#allocation3 + $0x68] sm:$0x3] %vm314_vm1, %v3909_v0  ;;  %349 = vst.msk [vmem:[#allocation3 + $0x78] sm:$0x3] %vm314_vm1, %v3909_v0  ;;  %v1063_v52 = vld [vmem:[#allocation10 + $0xd0] sm:$0xff]  ;;  %v941_v53 = vld [vmem:[#allocation9 + $0xc8] sm:$0xff] }
  0x8e   : > { %351 = vst.msk [vmem:[#allocation3 + $0x88] sm:$0x3] %vm314_vm1, %v3909_v0  ;;  %353 = vst.msk [vmem:[#allocation3 + $0x98] sm:$0x3] %vm314_vm1, %v3909_v0  ;;  %v1062_v54 = vld [vmem:[#allocation10 + $0xc8] sm:$0xff]  ;;  %v940_v55 = vld [vmem:[#allocation9 + $0xc0] sm:$0xff] }
  0x8f   : > { %363 = vst.msk [vmem:[#allocation2 + $0x11] sm:$0xff] %vm312_vm0, %v354_v9  ;;  %380 = vst.msk [vmem:[#allocation3 + $0x11] sm:$0xff] %vm312_vm0, %v371_v11  ;;  %v1061_v57 = vld [vmem:[#allocation10 + $0xc0] sm:$0xff]  ;;  %v1205_v59 = vld [vmem:[#allocation9 + $0x38] sm:$0xff] }
  0x90   : > { %364 = vst.msk [vmem:[#allocation2 + $0x21] sm:$0xff] %vm312_vm0, %v355_v12  ;;  %365 = vst.msk [vmem:[#allocation2 + $0x31] sm:$0xff] %vm312_vm0, %v356_v14  ;;  %v1347_v60 = vld [vmem:[#allocation10 + $0x38] sm:$0xff]  ;;  %v1204_v61 = vld [vmem:[#allocation9 + $0x30] sm:$0xff] }
  0x91   : > { %381 = vst.msk [vmem:[#allocation3 + $0x21] sm:$0xff] %vm312_vm0, %v372_v15  ;;  %382 = vst.msk [vmem:[#allocation3 + $0x31] sm:$0xff] %vm312_vm0, %v373_v17  ;;  %v1346_v62 = vld [vmem:[#allocation10 + $0x30] sm:$0xff]  ;;  %v1203_v63 = vld [vmem:[#allocation9 + $0x28] sm:$0xff] }
  0x92   : > { %366 = vst.msk [vmem:[#allocation2 + $0x41] sm:$0xff] %vm312_vm0, %v357_v18  ;;  %367 = vst.msk [vmem:[#allocation2 + $0x51] sm:$0xff] %vm312_vm0, %v358_v20  ;;  %v1345_v0 = vld [vmem:[#allocation10 + $0x28] sm:$0xff]  ;;  %v1202_v1 = vld [vmem:[#allocation9 + $0x20] sm:$0xff] }
  0x93   : > { %383 = vst.msk [vmem:[#allocation3 + $0x41] sm:$0xff] %vm312_vm0, %v374_v21  ;;  %384 = vst.msk [vmem:[#allocation3 + $0x51] sm:$0xff] %vm312_vm0, %v375_v22  ;;  %v404_v2 = vld [vmem:[#allocation2 + $0x90] sm:$0xff]  ;;  %v1344_v3 = vld [vmem:[#allocation10 + $0x20] sm:$0xff] }
  0x94   : > { %368 = vst.msk [vmem:[#allocation2 + $0x61] sm:$0xff] %vm312_vm0, %v359_v23  ;;  %369 = vst.msk [vmem:[#allocation2 + $0x71] sm:$0xff] %vm312_vm0, %v360_v24  ;;  %v414_v4 = vld [vmem:[#allocation3 + $0x90] sm:$0xff]  ;;  %v1181_v5 = vld [vmem:[#allocation2 + $0x1] sm:$0xff] }
  0x95   : > { %385 = vst.msk [vmem:[#allocation3 + $0x61] sm:$0xff] %vm312_vm0, %v376_v25  ;;  %386 = vst.msk [vmem:[#allocation3 + $0x71] sm:$0xff] %vm312_vm0, %v377_v26  ;;  %v1191_v6 = vld [vmem:[#allocation3 + $0x1] sm:$0xff]  ;;  %v1489_v7 = vld [vmem:[#allocation9 + $0x98] sm:$0xff] }
  0x96   : > { %v396_v27 = vld [vmem:[#allocation2 + $0x10] sm:$0xff]  ;;  %370 = vst.msk [vmem:[#allocation2 + $0x81] sm:$0xff] %vm312_vm0, %v361_v36  ;;  %387 = vst.msk [vmem:[#allocation3 + $0x81] sm:$0xff] %vm312_vm0, %v378_v41  ;;  %v1610_v9 = vld [vmem:[#allocation10 + $0x98] sm:$0xff] }
  0x97   : > { %3289 = vmatmul.mubr.msk.f32.vlgmr.msra.gmra.mxu0 %vm312_vm0, %v396_v27  ;;  %v406_v28 = vld [vmem:[#allocation3 + $0x10] sm:$0xff]  ;;  %v4221_v29 = vld [vmem:[#allocation2 + $0x20] sm:$0xff]  ;;  %v1608_v21 = vld [vmem:[#allocation10 + $0x88] sm:$0xff] }
  0x98   : > { %3309 = vmatmul.mubr.msk.f32.vlgmr.msra.gmra.mxu1 %vm312_vm0, %v406_v28  ;;  %3321 = vmatpush3.msra.mxu0 %v701_v16  ;;  %v4224_v31 = vld [vmem:[#allocation2 + $0x30] sm:$0xff]  ;;  %v4226_v32 = vld [vmem:[#allocation3 + $0x20] sm:$0xff] }
  0x99   : > { %3291 = vmatprep.mubr.msk.f32.mxu0 %vm312_vm0, %v4221_v29  ;;  %3341 = vmatpush3.msra.mxu1 %v822_v19  ;;  %v4230_v34 = vld [vmem:[#allocation3 + $0x30] sm:$0xff]  ;;  %v4234_v35 = vld [vmem:[#allocation2 + $0x40] sm:$0xff]  ;;  %v1487_v19 = vld [vmem:[#allocation9 + $0x88] sm:$0xff] }
  0x9a   : > { %3311 = vmatprep.mubr.msk.f32.mxu1 %vm312_vm0, %v4226_v32  ;;  %3322 = vmatprep.subr.mxu0 %v700_v30  ;;  %v4239_v37 = vld [vmem:[#allocation3 + $0x40] sm:$0xff]  ;;  %v4244_v39 = vld [vmem:[#allocation2 + $0x50] sm:$0xff] }
  0x9b   : > { %3292 = vmatmul.mubr.msk.f32.gmra.mxu0 %vm312_vm0, %v4224_v31  ;;  %3342 = vmatprep.subr.mxu1 %v821_v33  ;;  %v4249_v42 = vld [vmem:[#allocation3 + $0x50] sm:$0xff]  ;;  %v4254_v43 = vld [vmem:[#allocation2 + $0x60] sm:$0xff] }
  0x9c   : > { %3312 = vmatmul.mubr.msk.f32.gmra.mxu1 %vm312_vm0, %v4230_v34  ;;  %3323 = vmatpush3.msra.mxu0 %v700_v30  ;;  %v4258_v44 = vld [vmem:[#allocation3 + $0x60] sm:$0xff]  ;;  %v4262_v46 = vld [vmem:[#allocation2 + $0x70] sm:$0xff]  ;;  %v1852_v30 = vld [vmem:[#allocation10 + $0xf8] sm:$0xff] }
  0x9d   : > { %3294 = vmatprep.mubr.msk.f32.mxu0 %vm312_vm0, %v4234_v35  ;;  %3343 = vmatpush3.msra.mxu1 %v821_v33  ;;  %v4266_v48 = vld [vmem:[#allocation3 + $0x70] sm:$0xff]  ;;  %v403_v56 = vld [vmem:[#allocation2 + $0x80] sm:$0xff]  ;;  %v1729_v33 = vld [vmem:[#allocation9 + $0xe8] sm:$0xff] }
  0x9e   : > { %3314 = vmatprep.mubr.msk.f32.mxu1 %vm312_vm0, %v4239_v37  ;;  %3324 = vmatprep.subr.mxu0 %v699_v38  ;;  %v413_v58 = vld [vmem:[#allocation3 + $0x80] sm:$0xff]  ;;  %v1182_v8 = vld [vmem:[#allocation2 + $0x11] sm:$0xff] }
  0x9f   : > { %3295 = vmatmul.mubr.msk.f32.gmra.mxu0 %vm312_vm0, %v4244_v39  ;;  %3344 = vmatprep.subr.mxu1 %v820_v40  ;;  %v1192_v10 = vld [vmem:[#allocation3 + $0x11] sm:$0xff]  ;;  %v4332_v11 = vld [vmem:[#allocation2 + $0x21] sm:$0xff] }
  0xa0   : > { %3315 = vmatmul.mubr.msk.f32.gmra.mxu1 %vm312_vm0, %v4249_v42  ;;  %3325 = vmatpush3.msra.mxu0 %v699_v38  ;;  %v4335_v12 = vld [vmem:[#allocation3 + $0x21] sm:$0xff]  ;;  %v1488_v13 = vld [vmem:[#allocation9 + $0x90] sm:$0xff] }
  0xa1   : > { %3297 = vmatprep.mubr.msk.f32.mxu0 %vm312_vm0, %v4254_v43  ;;  %3345 = vmatpush3.msra.mxu1 %v820_v40  ;;  %v4338_v14 = vld [vmem:[#allocation2 + $0x31] sm:$0xff]  ;;  %v4346_v17 = vld [vmem:[#allocation2 + $0x41] sm:$0xff] }
  0xa2   : > { %3317 = vmatprep.mubr.msk.f32.mxu1 %vm312_vm0, %v4258_v44  ;;  %3326 = vmatprep.subr.mxu0 %v698_v45  ;;  %v1609_v15 = vld [vmem:[#allocation10 + $0x90] sm:$0xff]  ;;  %v4350_v18 = vld [vmem:[#allocation3 + $0x41] sm:$0xff]  ;;  %v2135_v40 = vld [vmem:[#allocation10 + $0x58] sm:$0xff] }
  0xa3   : > { %3298 = vmatmul.mubr.msk.f32.gmra.mxu0 %vm312_vm0, %v4262_v46  ;;  %3346 = vmatprep.subr.mxu1 %v819_v47  ;;  %v4342_v16 = vld [vmem:[#allocation3 + $0x31] sm:$0xff]  ;;  %v4362_v23 = vld [vmem:[#allocation2 + $0x61] sm:$0xff] }
  0xa4   : > { %3318 = vmatmul.mubr.msk.f32.gmra.mxu1 %vm312_vm0, %v4266_v48  ;;  %3327 = vmatpush3.msra.mxu0 %v698_v45  ;;  %v4354_v20 = vld [vmem:[#allocation2 + $0x51] sm:$0xff]  ;;  %v4366_v24 = vld [vmem:[#allocation3 + $0x61] sm:$0xff] }
  0xa5   : > { %3328 = vmatprep.mubr.msk.f32.mxu0 %vm312_vm0, %v396_v27  ;;  %3347 = vmatpush3.msra.mxu1 %v819_v47  ;;  %v4358_v22 = vld [vmem:[#allocation3 + $0x51] sm:$0xff]  ;;  %v1486_v25 = vld [vmem:[#allocation9 + $0x80] sm:$0xff] }
  0xa6   : > { %3348 = vmatprep.mubr.msk.f32.mxu1 %vm312_vm0, %v406_v28  ;;  %3360 = vmatprep.subr.mxu0 %v943_v49  ;;  %v4370_v26 = vld [vmem:[#allocation2 + $0x71] sm:$0xff]  ;;  %v1607_v27 = vld [vmem:[#allocation10 + $0x80] sm:$0xff] }
  0xa7   : > { %3329 = vmatmul.mubr.msk.f32.vlgmr.msra.gmra.mxu0 %vm312_vm0, %v4221_v29  ;;  %3380 = vmatprep.subr.mxu1 %v1064_v50  ;;  %v4374_v28 = vld [vmem:[#allocation3 + $0x71] sm:$0xff]  ;;  %v1189_v36 = vld [vmem:[#allocation2 + $0x81] sm:$0xff] }
  0xa8   : > { %3349 = vmatmul.mubr.msk.f32.vlgmr.msra.gmra.mxu1 %vm312_vm0, %v4226_v32  ;;  %3361 = vmatpush3.msra.mxu0 %v943_v49  ;;  %v1199_v38 = vld [vmem:[#allocation3 + $0x81] sm:$0xff]  ;;  %v1992_v41 = vld [vmem:[#allocation9 + $0x50] sm:$0xff] }
  0xa9   : > { %3331 = vmatprep.mubr.msk.f32.mxu0 %vm312_vm0, %v4224_v31  ;;  %3381 = vmatpush3.msra.mxu1 %v1064_v50  ;;  %v1990_v45 = vld [vmem:[#allocation9 + $0x40] sm:$0xff] }
  0xaa   : > { %3351 = vmatprep.mubr.msk.f32.mxu1 %vm312_vm0, %v4230_v34  ;;  %3362 = vmatprep.subr.mxu0 %v942_v51  ;;  %v2132_v47 = vld [vmem:[#allocation10 + $0x40] sm:$0xff] }
  0xab   : > { %3332 = vmatmul.mubr.msk.f32.gmra.mxu0 %vm312_vm0, %v4234_v35  ;;  %3382 = vmatprep.subr.mxu1 %v1063_v52  ;;  %v1969_v49 = vld [vmem:[#allocation2 + $0x2] sm:$0xff] }
  0xac   : > { %3352 = vmatmul.mubr.msk.f32.gmra.mxu1 %vm312_vm0, %v4239_v37  ;;  %3363 = vmatpush3.msra.mxu0 %v942_v51  ;;  %v1979_v50 = vld [vmem:[#allocation3 + $0x2] sm:$0xff]  ;;  %v2277_v51 = vld [vmem:[#allocation9 + $0xb8] sm:$0xff] }
  0xad   : > { %3334 = vmatprep.mubr.msk.f32.mxu0 %vm312_vm0, %v4244_v39  ;;  %3383 = vmatpush3.msra.mxu1 %v1063_v52  ;;  %v1970_v52 = vld [vmem:[#allocation2 + $0x12] sm:$0xff] }
  0xae   : > { %3354 = vmatprep.mubr.msk.f32.mxu1 %vm312_vm0, %v4249_v42  ;;  %3364 = vmatprep.subr.mxu0 %v941_v53 }
  0xaf   : > { %3335 = vmatmul.mubr.msk.f32.gmra.mxu0 %vm312_vm0, %v4254_v43  ;;  %3384 = vmatprep.subr.mxu1 %v1062_v54 }
  0xb0   : > { %3355 = vmatmul.mubr.msk.f32.gmra.mxu1 %vm312_vm0, %v4258_v44  ;;  %3365 = vmatpush3.msra.mxu0 %v941_v53  ;;  %v2398_v53 = vld [vmem:[#allocation10 + $0xb8] sm:$0xff] }
  0xb1   : > { %3337 = vmatprep.mubr.msk.f32.mxu0 %vm312_vm0, %v4262_v46  ;;  %3385 = vmatpush3.msra.mxu1 %v1062_v54  ;;  %v1980_v54 = vld [vmem:[#allocation3 + $0x12] sm:$0xff] }
  0xb2   : > { %3357 = vmatprep.mubr.msk.f32.mxu1 %vm312_vm0, %v4266_v48  ;;  %3366 = vmatprep.subr.mxu0 %v940_v55 }
  0xb3   : > { %3338 = vmatmul.mubr.msk.f32.gmra.mxu0 %vm312_vm0, %v403_v56  ;;  %3386 = vmatprep.subr.mxu1 %v1061_v57 }
  0xb4   : > { %3358 = vmatmul.mubr.msk.f32.gmra.mxu1 %vm312_vm0, %v413_v58  ;;  %3367 = vmatpush3.msra.mxu0 %v940_v55  ;;  %v4440_v55 = vld [vmem:[#allocation2 + $0x22] sm:$0xff] }
  0xb5   : > { %3368 = vmatprep.mubr.msk.f32.mxu0 %vm312_vm0, %v4221_v29  ;;  %3387 = vmatpush3.msra.mxu1 %v1061_v57  ;;  %v1731_v29 = vld [vmem:[#allocation9 + $0xf8] sm:$0xff]  ;;  %v2276_v57 = vld [vmem:[#allocation9 + $0xb0] sm:$0xff] }
  0xb6   : > { %3388 = vmatprep.mubr.msk.f32.mxu1 %vm312_vm0, %v4226_v32  ;;  %3400 = vmatprep.subr.mxu0 %v1205_v59  ;;  %v1851_v32 = vld [vmem:[#allocation10 + $0xf0] sm:$0xff] }
  0xb7   : > { %3369 = vmatmul.mubr.msk.f32.vlgmr.msra.gmra.mxu0 %vm312_vm0, %v4224_v31  ;;  %3420 = vmatprep.subr.mxu1 %v1347_v60  ;;  %v1730_v31 = vld [vmem:[#allocation9 + $0xf0] sm:$0xff] }
  0xb8   : > { %3389 = vmatmul.mubr.msk.f32.vlgmr.msra.gmra.mxu1 %vm312_vm0, %v4230_v34  ;;  %3401 = vmatpush3.msra.mxu0 %v1205_v59  ;;  %v1850_v34 = vld [vmem:[#allocation10 + $0xe8] sm:$0xff]  ;;  %v2397_v59 = vld [vmem:[#allocation10 + $0xb0] sm:$0xff] }
  0xb9   : > { %3371 = vmatprep.mubr.msk.f32.mxu0 %vm312_vm0, %v4234_v35  ;;  %3421 = vmatpush3.msra.mxu1 %v1347_v60  ;;  %v1728_v35 = vld [vmem:[#allocation9 + $0xe0] sm:$0xff]  ;;  %v4450_v60 = vld [vmem:[#allocation3 + $0x32] sm:$0xff] }
  0xba   : > { %3391 = vmatprep.mubr.msk.f32.mxu1 %vm312_vm0, %v4239_v37  ;;  %3402 = vmatprep.subr.mxu0 %v1204_v61  ;;  %v1849_v37 = vld [vmem:[#allocation10 + $0xe0] sm:$0xff] }
  0xbb   : > { %3372 = vmatmul.mubr.msk.f32.gmra.mxu0 %vm312_vm0, %v4244_v39  ;;  %3422 = vmatprep.subr.mxu1 %v1346_v62  ;;  %v1993_v39 = vld [vmem:[#allocation9 + $0x58] sm:$0xff] }
  0xbc   : > { %3392 = vmatmul.mubr.msk.f32.gmra.mxu1 %vm312_vm0, %v4249_v42  ;;  %3403 = vmatpush3.msra.mxu0 %v1204_v61  ;;  %v2134_v42 = vld [vmem:[#allocation10 + $0x50] sm:$0xff]  ;;  %v4454_v61 = vld [vmem:[#allocation2 + $0x42] sm:$0xff] }
  0xbd   : > { %3374 = vmatprep.mubr.msk.f32.mxu0 %vm312_vm0, %v4254_v43  ;;  %3423 = vmatpush3.msra.mxu1 %v1346_v62  ;;  %v1991_v43 = vld [vmem:[#allocation9 + $0x48] sm:$0xff] }
  0xbe   : > { %3394 = vmatprep.mubr.msk.f32.mxu1 %vm312_vm0, %v4258_v44  ;;  %3404 = vmatprep.subr.mxu0 %v1203_v63  ;;  %v2133_v44 = vld [vmem:[#allocation10 + $0x48] sm:$0xff] }
  0xbf   : > { %3375 = vmatmul.mubr.msk.f32.gmra.mxu0 %vm312_vm0, %v4262_v46  ;;  %3424 = vmatprep.subr.mxu1 %v1345_v0  ;;  %v1190_v46 = vld [vmem:[#allocation2 + $0x91] sm:$0xff]  ;;  %v4458_v62 = vld [vmem:[#allocation3 + $0x42] sm:$0xff] }
  0xc0   : > { %3395 = vmatmul.mubr.msk.f32.gmra.mxu1 %vm312_vm0, %v4266_v48  ;;  %3405 = vmatpush3.msra.mxu0 %v1203_v63  ;;  %v1200_v48 = vld [vmem:[#allocation3 + $0x91] sm:$0xff]  ;;  %v2275_v63 = vld [vmem:[#allocation9 + $0xa8] sm:$0xff] }
  0xc1   : > { %3377 = vmatprep.mubr.msk.f32.mxu0 %vm312_vm0, %v403_v56  ;;  %3425 = vmatpush3.msra.mxu1 %v1345_v0  ;;  %v4443_v56 = vld [vmem:[#allocation3 + $0x22] sm:$0xff]  ;;  %v4462_v0 = vld [vmem:[#allocation2 + $0x52] sm:$0xff] }
  0xc2   : > { %3397 = vmatprep.mubr.msk.f32.mxu1 %vm312_vm0, %v413_v58  ;;  %3406 = vmatprep.subr.mxu0 %v1202_v1  ;;  %v4446_v58 = vld [vmem:[#allocation2 + $0x32] sm:$0xff] }
  0xc3   : > { %3378 = vmatmul.mubr.msk.f32.gmra.mxu0 %vm312_vm0, %v404_v2  ;;  %3426 = vmatprep.subr.mxu1 %v1344_v3  ;;  %v4466_v2 = vld [vmem:[#allocation3 + $0x52] sm:$0xff] }
  0xc4   : > { %3398 = vmatmul.mubr.msk.f32.gmra.mxu1 %vm312_vm0, %v414_v4  ;;  %3407 = vmatpush3.msra.mxu0 %v1202_v1  ;;  %v2396_v1 = vld [vmem:[#allocation10 + $0xa8] sm:$0xff] }
  0xc5   : > { %3408 = vmatprep.mubr.msk.f32.mxu0 %vm312_vm0, %v1181_v5  ;;  %3427 = vmatpush3.msra.mxu1 %v1344_v3  ;;  %v4470_v3 = vld [vmem:[#allocation2 + $0x62] sm:$0xff] }
  0xc6   : > { %3428 = vmatprep.mubr.msk.f32.mxu1 %vm312_vm0, %v1191_v6  ;;  %3440 = vmatprep.subr.mxu0 %v1489_v7  ;;  %v4474_v4 = vld [vmem:[#allocation3 + $0x62] sm:$0xff]  ;;  %v4478_v6 = vld [vmem:[#allocation2 + $0x72] sm:$0xff] }
  0xc7   : > { %3409 = vmatmul.mubr.msk.f32.vlgmr.msra.gmra.mxu0 %vm312_vm0, %v1182_v8  ;;  %3460 = vmatprep.subr.mxu1 %v1610_v9  ;;  %v2274_v5 = vld [vmem:[#allocation9 + $0xa0] sm:$0xff] }
  0xc8   : > { %3429 = vmatmul.mubr.msk.f32.vlgmr.msra.gmra.mxu1 %vm312_vm0, %v1192_v10  ;;  %3441 = vmatpush3.msra.mxu0 %v1489_v7  ;;  %v2395_v7 = vld [vmem:[#allocation10 + $0xa0] sm:$0xff] }
  0xc9   : > { %3411 = vmatprep.mubr.msk.f32.mxu0 %vm312_vm0, %v4332_v11  ;;  %3461 = vmatpush3.msra.mxu1 %v1610_v9  ;;  %v2519_v9 = vld [vmem:[#allocation9 + $0x118] sm:$0xff] }
  0xca   : > { %3431 = vmatprep.mubr.msk.f32.mxu1 %vm312_vm0, %v4335_v12  ;;  %3442 = vmatprep.subr.mxu0 %v1488_v13 }
  0xcb   : > { %3412 = vmatmul.mubr.msk.f32.gmra.mxu0 %vm312_vm0, %v4338_v14  ;;  %3462 = vmatprep.subr.mxu1 %v1609_v15 }
  0xcc   : > { %3432 = vmatmul.mubr.msk.f32.gmra.mxu1 %vm312_vm0, %v4342_v16  ;;  %3443 = vmatpush3.msra.mxu0 %v1488_v13  ;;  %v2517_v13 = vld [vmem:[#allocation9 + $0x108] sm:$0xff] }
  0xcd   : > { %3414 = vmatprep.mubr.msk.f32.mxu0 %vm312_vm0, %v4346_v17  ;;  %3463 = vmatpush3.msra.mxu1 %v1609_v15  ;;  %v2516_v15 = vld [vmem:[#allocation9 + $0x100] sm:$0xff] }
  0xce   : > { %3434 = vmatprep.mubr.msk.f32.mxu1 %vm312_vm0, %v4350_v18  ;;  %3444 = vmatprep.subr.mxu0 %v1487_v19 }
  0xcf   : > { %3415 = vmatmul.mubr.msk.f32.gmra.mxu0 %vm312_vm0, %v4354_v20  ;;  %3464 = vmatprep.subr.mxu1 %v1608_v21 }
  0xd0   : > { %3435 = vmatmul.mubr.msk.f32.gmra.mxu1 %vm312_vm0, %v4358_v22  ;;  %3445 = vmatpush3.msra.mxu0 %v1487_v19  ;;  %v1978_v19 = vld [vmem:[#allocation2 + $0x92] sm:$0xff] }
  0xd1   : > { %3417 = vmatprep.mubr.msk.f32.mxu0 %vm312_vm0, %v4362_v23  ;;  %3465 = vmatpush3.msra.mxu1 %v1608_v21  ;;  %v2911_v21 = vld [vmem:[%s4762_s4] ss:$0 sm:$0xff] }
  0xd2   : > { %3437 = vmatprep.mubr.msk.f32.mxu1 %vm312_vm0, %v4366_v24  ;;  %3446 = vmatprep.subr.mxu0 %v1486_v25 }
  0xd3   : > { %3418 = vmatmul.mubr.msk.f32.gmra.mxu0 %vm312_vm0, %v4370_v26  ;;  %3466 = vmatprep.subr.mxu1 %v1607_v27 }
  0xd4   : > { %3438 = vmatmul.mubr.msk.f32.gmra.mxu1 %vm312_vm0, %v4374_v28  ;;  %3447 = vmatpush3.msra.mxu0 %v1486_v25 }
  0xd5   : > { %3448 = vmatprep.mubr.msk.f32.mxu0 %vm312_vm0, %v1182_v8  ;;  %3467 = vmatpush3.msra.mxu1 %v1607_v27  ;;  %v1986_v8 = vld [vmem:[#allocation3 + $0x72] sm:$0xff] }
  0xd6   : > { %3468 = vmatprep.mubr.msk.f32.mxu1 %vm312_vm0, %v1192_v10  ;;  %3480 = vmatprep.subr.mxu0 %v1731_v29  ;;  %v2640_v10 = vld [vmem:[#allocation10 + $0x118] sm:$0xff] }
  0xd7   : > { %3449 = vmatmul.mubr.msk.f32.vlgmr.msra.gmra.mxu0 %vm312_vm0, %v4332_v11  ;;  %3500 = vmatprep.subr.mxu1 %v1852_v30 }
  0xd8   : > { %3469 = vmatmul.mubr.msk.f32.vlgmr.msra.gmra.mxu1 %vm312_vm0, %v4335_v12  ;;  %3481 = vmatpush3.msra.mxu0 %v1731_v29 }
  0xd9   : > { %3451 = vmatprep.mubr.msk.f32.mxu0 %vm312_vm0, %v4338_v14  ;;  %3501 = vmatpush3.msra.mxu1 %v1852_v30 }
  0xda   : > { %3471 = vmatprep.mubr.msk.f32.mxu1 %vm312_vm0, %v4342_v16  ;;  %3482 = vmatprep.subr.mxu0 %v1730_v31 }
  0xdb   : > { %3452 = vmatmul.mubr.msk.f32.gmra.mxu0 %vm312_vm0, %v4346_v17  ;;  %3502 = vmatprep.subr.mxu1 %v1851_v32 }
  0xdc   : > { %3472 = vmatmul.mubr.msk.f32.gmra.mxu1 %vm312_vm0, %v4350_v18  ;;  %3483 = vmatpush3.msra.mxu0 %v1730_v31 }
  0xdd   : > { %3454 = vmatprep.mubr.msk.f32.mxu0 %vm312_vm0, %v4354_v20  ;;  %3503 = vmatpush3.msra.mxu1 %v1851_v32 }
  0xde   : > { %3474 = vmatprep.mubr.msk.f32.mxu1 %vm312_vm0, %v4358_v22  ;;  %3484 = vmatprep.subr.mxu0 %v1729_v33 }
  0xdf   : > { %3455 = vmatmul.mubr.msk.f32.gmra.mxu0 %vm312_vm0, %v4362_v23  ;;  %3504 = vmatprep.subr.mxu1 %v1850_v34 }
  0xe0   : > { %3475 = vmatmul.mubr.msk.f32.gmra.mxu1 %vm312_vm0, %v4366_v24  ;;  %3485 = vmatpush3.msra.mxu0 %v1729_v33 }
  0xe1   : > { %3457 = vmatprep.mubr.msk.f32.mxu0 %vm312_vm0, %v4370_v26  ;;  %3505 = vmatpush3.msra.mxu1 %v1850_v34 }
  0xe2   : > { %3477 = vmatprep.mubr.msk.f32.mxu1 %vm312_vm0, %v4374_v28  ;;  %3486 = vmatprep.subr.mxu0 %v1728_v35 }
  0xe3   : > { %3458 = vmatmul.mubr.msk.f32.gmra.mxu0 %vm312_vm0, %v1189_v36  ;;  %3506 = vmatprep.subr.mxu1 %v1849_v37 }
  0xe4   : > { %3478 = vmatmul.mubr.msk.f32.gmra.mxu1 %vm312_vm0, %v1199_v38  ;;  %3487 = vmatpush3.msra.mxu0 %v1728_v35 }
  0xe5   : > { %3488 = vmatprep.mubr.msk.f32.mxu0 %vm312_vm0, %v4332_v11  ;;  %3507 = vmatpush3.msra.mxu1 %v1849_v37  ;;  %v2518_v11 = vld [vmem:[#allocation9 + $0x110] sm:$0xff] }
  0xe6   : > { %3508 = vmatprep.mubr.msk.f32.mxu1 %vm312_vm0, %v4335_v12  ;;  %3520 = vmatprep.subr.mxu0 %v1993_v39  ;;  %v2639_v12 = vld [vmem:[#allocation10 + $0x110] sm:$0xff] }
  0xe7   : > { %3489 = vmatmul.mubr.msk.f32.vlgmr.msra.gmra.mxu0 %vm312_vm0, %v4338_v14  ;;  %3540 = vmatprep.subr.mxu1 %v2135_v40  ;;  %v2638_v14 = vld [vmem:[#allocation10 + $0x108] sm:$0xff] }
  0xe8   : > { %3509 = vmatmul.mubr.msk.f32.vlgmr.msra.gmra.mxu1 %vm312_vm0, %v4342_v16  ;;  %3521 = vmatpush3.msra.mxu0 %v1993_v39  ;;  %v1977_v16 = vld [vmem:[#allocation2 + $0x82] sm:$0xff] }
  0xe9   : > { %3491 = vmatprep.mubr.msk.f32.mxu0 %vm312_vm0, %v4346_v17  ;;  %3541 = vmatpush3.msra.mxu1 %v2135_v40  ;;  %v2637_v17 = vld [vmem:[#allocation10 + $0x100] sm:$0xff] }
  0xea   : > { %3511 = vmatprep.mubr.msk.f32.mxu1 %vm312_vm0, %v4350_v18  ;;  %3522 = vmatprep.subr.mxu0 %v1992_v41  ;;  %v1987_v18 = vld [vmem:[#allocation3 + $0x82] sm:$0xff] }
  0xeb   : > { %3492 = vmatmul.mubr.msk.f32.gmra.mxu0 %vm312_vm0, %v4354_v20  ;;  %3542 = vmatprep.subr.mxu1 %v2134_v42  ;;  %v1988_v20 = vld [vmem:[#allocation3 + $0x92] sm:$0xff] }
  0xec   : > { %3512 = vmatmul.mubr.msk.f32.gmra.mxu1 %vm312_vm0, %v4358_v22  ;;  %3523 = vmatpush3.msra.mxu0 %v1992_v41 }
  0xed   : > { %3494 = vmatprep.mubr.msk.f32.mxu0 %vm312_vm0, %v4362_v23  ;;  %3543 = vmatpush3.msra.mxu1 %v2134_v42 }
  0xee   : > { %3514 = vmatprep.mubr.msk.f32.mxu1 %vm312_vm0, %v4366_v24  ;;  %3524 = vmatprep.subr.mxu0 %v1991_v43 }
  0xef   : > { %3495 = vmatmul.mubr.msk.f32.gmra.mxu0 %vm312_vm0, %v4370_v26  ;;  %3544 = vmatprep.subr.mxu1 %v2133_v44 }
  0xf0   : > { %3515 = vmatmul.mubr.msk.f32.gmra.mxu1 %vm312_vm0, %v4374_v28  ;;  %3525 = vmatpush3.msra.mxu0 %v1991_v43 }
  0xf1   : > { %3497 = vmatprep.mubr.msk.f32.mxu0 %vm312_vm0, %v1189_v36  ;;  %3545 = vmatpush3.msra.mxu1 %v2133_v44 }
  0xf2   : > { %3517 = vmatprep.mubr.msk.f32.mxu1 %vm312_vm0, %v1199_v38  ;;  %3526 = vmatprep.subr.mxu0 %v1990_v45 }
  0xf3   : > { %3498 = vmatmul.mubr.msk.f32.gmra.mxu0 %vm312_vm0, %v1190_v46  ;;  %3546 = vmatprep.subr.mxu1 %v2132_v47 }
  0xf4   : > { %3518 = vmatmul.mubr.msk.f32.gmra.mxu1 %vm312_vm0, %v1200_v48  ;;  %3527 = vmatpush3.msra.mxu0 %v1990_v45 }
  0xf5   : > { %3528 = vmatprep.mubr.msk.f32.mxu0 %vm312_vm0, %v1969_v49  ;;  %3547 = vmatpush3.msra.mxu1 %v2132_v47 }
  0xf6   : > { %3548 = vmatprep.mubr.msk.f32.mxu1 %vm312_vm0, %v1979_v50  ;;  %3560 = vmatprep.subr.mxu0 %v2277_v51 }
  0xf7   : > { %3529 = vmatmul.mubr.msk.f32.vlgmr.msra.gmra.mxu0 %vm312_vm0, %v1970_v52  ;;  %3580 = vmatprep.subr.mxu1 %v2398_v53 }
  0xf8   : > { %3549 = vmatmul.mubr.msk.f32.vlgmr.msra.gmra.mxu1 %vm312_vm0, %v1980_v54  ;;  %3561 = vmatpush3.msra.mxu0 %v2277_v51 }
  0xf9   : > { %3531 = vmatprep.mubr.msk.f32.mxu0 %vm312_vm0, %v4440_v55  ;;  %3581 = vmatpush3.msra.mxu1 %v2398_v53 }
  0xfa   : > { %3551 = vmatprep.mubr.msk.f32.mxu1 %vm312_vm0, %v4443_v56  ;;  %3562 = vmatprep.subr.mxu0 %v2276_v57 }
  0xfb   : > { %3532 = vmatmul.mubr.msk.f32.gmra.mxu0 %vm312_vm0, %v4446_v58  ;;  %3582 = vmatprep.subr.mxu1 %v2397_v59 }
  0xfc   : > { %3552 = vmatmul.mubr.msk.f32.gmra.mxu1 %vm312_vm0, %v4450_v60  ;;  %3563 = vmatpush3.msra.mxu0 %v2276_v57 }
  0xfd   : > { %3534 = vmatprep.mubr.msk.f32.mxu0 %vm312_vm0, %v4454_v61  ;;  %3583 = vmatpush3.msra.mxu1 %v2397_v59 }
  0xfe   : > { %3554 = vmatprep.mubr.msk.f32.mxu1 %vm312_vm0, %v4458_v62  ;;  %3564 = vmatprep.subr.mxu0 %v2275_v63 }
  0xff   : > { %3535 = vmatmul.mubr.msk.f32.gmra.mxu0 %vm312_vm0, %v4462_v0  ;;  %3584 = vmatprep.subr.mxu1 %v2396_v1 }
 0x100   : > { %3555 = vmatmul.mubr.msk.f32.gmra.mxu1 %vm312_vm0, %v4466_v2  ;;  %3565 = vmatpush3.msra.mxu0 %v2275_v63 }
 0x101   : > { %3537 = vmatprep.mubr.msk.f32.mxu0 %vm312_vm0, %v4470_v3  ;;  %3585 = vmatpush3.msra.mxu1 %v2396_v1 }
 0x102   : > { %3557 = vmatprep.mubr.msk.f32.mxu1 %vm312_vm0, %v4474_v4  ;;  %3566 = vmatprep.subr.mxu0 %v2274_v5 }
 0x103   : > { %3538 = vmatmul.mubr.msk.f32.gmra.mxu0 %vm312_vm0, %v4478_v6  ;;  %3586 = vmatprep.subr.mxu1 %v2395_v7 }
 0x104   : > { %3558 = vmatmul.mubr.msk.f32.gmra.mxu1 %vm312_vm0, %v1986_v8  ;;  %3567 = vmatpush3.msra.mxu0 %v2274_v5 }
 0x105   : > { %3568 = vmatprep.mubr.msk.f32.mxu0 %vm312_vm0, %v1970_v52  ;;  %3587 = vmatpush3.msra.mxu1 %v2395_v7 }
 0x106   : > { %3588 = vmatprep.mubr.msk.f32.mxu1 %vm312_vm0, %v1980_v54  ;;  %3600 = vmatprep.subr.mxu0 %v2519_v9 }
 0x107   : > { %3569 = vmatmul.mubr.msk.f32.vlgmr.msra.gmra.mxu0 %vm312_vm0, %v4440_v55  ;;  %3620 = vmatprep.subr.mxu1 %v2640_v10 }
 0x108   : > { %3589 = vmatmul.mubr.msk.f32.vlgmr.msra.gmra.mxu1 %vm312_vm0, %v4443_v56  ;;  %3601 = vmatpush3.msra.mxu0 %v2519_v9 }
 0x109   : > { %3571 = vmatprep.mubr.msk.f32.mxu0 %vm312_vm0, %v4446_v58  ;;  %3621 = vmatpush3.msra.mxu1 %v2640_v10 }
 0x10a   : > { %3591 = vmatprep.mubr.msk.f32.mxu1 %vm312_vm0, %v4450_v60  ;;  %3602 = vmatprep.subr.mxu0 %v2518_v11 }
 0x10b   : > { %3572 = vmatmul.mubr.msk.f32.gmra.mxu0 %vm312_vm0, %v4454_v61  ;;  %3622 = vmatprep.subr.mxu1 %v2639_v12 }
 0x10c   : > { %3592 = vmatmul.mubr.msk.f32.gmra.mxu1 %vm312_vm0, %v4458_v62  ;;  %3603 = vmatpush3.msra.mxu0 %v2518_v11 }
 0x10d   : > { %3574 = vmatprep.mubr.msk.f32.mxu0 %vm312_vm0, %v4462_v0  ;;  %3623 = vmatpush3.msra.mxu1 %v2639_v12 }
 0x10e   : > { %3594 = vmatprep.mubr.msk.f32.mxu1 %vm312_vm0, %v4466_v2  ;;  %3604 = vmatprep.subr.mxu0 %v2517_v13 }
 0x10f   : > { %3575 = vmatmul.mubr.msk.f32.gmra.mxu0 %vm312_vm0, %v4470_v3  ;;  %3624 = vmatprep.subr.mxu1 %v2638_v14 }
 0x110   : > { %3595 = vmatmul.mubr.msk.f32.gmra.mxu1 %vm312_vm0, %v4474_v4  ;;  %3605 = vmatpush3.msra.mxu0 %v2517_v13 }
 0x111   : > { %3577 = vmatprep.mubr.msk.f32.mxu0 %vm312_vm0, %v4478_v6  ;;  %3625 = vmatpush3.msra.mxu1 %v2638_v14 }
 0x112   : > { %3597 = vmatprep.mubr.msk.f32.mxu1 %vm312_vm0, %v1986_v8  ;;  %3606 = vmatprep.subr.mxu0 %v2516_v15 }
 0x113   : > { %3578 = vmatmul.mubr.msk.f32.gmra.mxu0 %vm312_vm0, %v1977_v16  ;;  %3626 = vmatprep.subr.mxu1 %v2637_v17 }
 0x114   : > { %3598 = vmatmul.mubr.msk.f32.gmra.mxu1 %vm312_vm0, %v1987_v18  ;;  %3607 = vmatpush3.msra.mxu0 %v2516_v15 }
 0x115   : > { %3608 = vmatprep.mubr.msk.f32.mxu0 %vm312_vm0, %v4440_v55  ;;  %3627 = vmatpush3.msra.mxu1 %v2637_v17 }
 0x116   : > { %3628 = vmatprep.mubr.msk.f32.mxu1 %vm312_vm0, %v4443_v56 }
 0x117   : > { %3609 = vmatmul.mubr.msk.f32.vlgmr.msra.gmra.mxu0 %vm312_vm0, %v4446_v58 }
 0x118   : > { %3629 = vmatmul.mubr.msk.f32.vlgmr.msra.gmra.mxu1 %vm312_vm0, %v4450_v60  ;;  %3611 = vmatprep.mubr.msk.f32.mxu0 %vm312_vm0, %v4454_v61 }
 0x119   : > { %3631 = vmatprep.mubr.msk.f32.mxu1 %vm312_vm0, %v4458_v62 }
 0x11b   : > { %3612 = vmatmul.mubr.msk.f32.gmra.mxu0 %vm312_vm0, %v4462_v0 }
 0x11c   : > { %3632 = vmatmul.mubr.msk.f32.gmra.mxu1 %vm312_vm0, %v4466_v2  ;;  %3614 = vmatprep.mubr.msk.f32.mxu0 %vm312_vm0, %v4470_v3 }
 0x11d   : > { %3634 = vmatprep.mubr.msk.f32.mxu1 %vm312_vm0, %v4474_v4 }
 0x11f   : > { %3615 = vmatmul.mubr.msk.f32.gmra.mxu0 %vm312_vm0, %v4478_v6 }
 0x120   : > { %3635 = vmatmul.mubr.msk.f32.gmra.mxu1 %vm312_vm0, %v1986_v8  ;;  %3617 = vmatprep.mubr.msk.f32.mxu0 %vm312_vm0, %v1977_v16 }
 0x121   : > { %3637 = vmatprep.mubr.msk.f32.mxu1 %vm312_vm0, %v1987_v18 }
 0x123   : > { %3618 = vmatmul.mubr.msk.f32.gmra.mxu0 %vm312_vm0, %v1978_v19 }
 0x124   : > { %3638 = vmatmul.mubr.msk.f32.gmra.mxu1 %vm312_vm0, %v1988_v20 }
 0x157   : > { %v3290_v22 = vpop.f32.mrf.mxu0 }
 0x158   : > { %v549_v23 = vadd.f32 %v3290_v22, %v2911_v21  ;;  %v3310_v24 = vpop.f32.mrf.mxu1 }
 0x159   : > { %v509_v25 = vpop.f32.mrf.mxu0 }
 0x15a   : > { %v690_v26 = vadd.f32 %v3310_v24, %v549_v23  ;;  %v548_v27 = vadd.f32 %v2911_v21, %v509_v25  ;;  %v650_v28 = vpop.f32.mrf.mxu1 }
 0x15b   : > { %v3293_v29 = vpop.f32.mrf.mxu0 }
 0x15c   : > { %v689_v30 = vadd.f32 %v650_v28, %v548_v27  ;;  %v551_v31 = vadd.f32 %v3293_v29, %v2911_v21  ;;  %v3313_v32 = vpop.f32.mrf.mxu1 }
 0x15d   : > { %v519_v33 = vpop.f32.mrf.mxu0 }
 0x15e   : > { %v692_v34 = vadd.f32 %v3313_v32, %v551_v31  ;;  %v550_v35 = vadd.f32 %v2911_v21, %v519_v33  ;;  %v660_v36 = vpop.f32.mrf.mxu1 }
 0x15f   : > { %v3296_v37 = vpop.f32.mrf.mxu0 }
 0x160   : > { %v691_v38 = vadd.f32 %v660_v36, %v550_v35  ;;  %v553_v39 = vadd.f32 %v3296_v37, %v2911_v21  ;;  %v3316_v40 = vpop.f32.mrf.mxu1 }
 0x161   : > { %v529_v41 = vpop.f32.mrf.mxu0 }
 0x162   : > { %v694_v42 = vadd.f32 %v3316_v40, %v553_v39  ;;  %v552_v43 = vadd.f32 %v2911_v21, %v529_v41  ;;  %v670_v44 = vpop.f32.mrf.mxu1 }
 0x163   : > { %v3299_v45 = vpop.f32.mrf.mxu0 }
 0x164   : > { %v693_v46 = vadd.f32 %v670_v44, %v552_v43  ;;  %v555_v47 = vadd.f32 %v3299_v45, %v2911_v21  ;;  %v3319_v48 = vpop.f32.mrf.mxu1 }
 0x165   : > { %v539_v49 = vpop.f32.mrf.mxu0 }
 0x166   : > { %v696_v50 = vadd.f32 %v3319_v48, %v555_v47  ;;  %v554_v51 = vadd.f32 %v2911_v21, %v539_v49  ;;  %v680_v52 = vpop.f32.mrf.mxu1 }
 0x167   : > { %v3330_v53 = vpop.f32.mrf.mxu0 }
 0x168   : > { %v695_v54 = vadd.f32 %v680_v52, %v554_v51  ;;  %v811_v55 = vadd.f32 %v3330_v53, %v690_v26  ;;  %v3350_v56 = vpop.f32.mrf.mxu1 }
 0x169   : > { %v771_v57 = vpop.f32.mrf.mxu0 }
 0x16a   : > { %v932_v58 = vadd.f32 %v3350_v56, %v811_v55  ;;  %v810_v59 = vadd.f32 %v771_v57, %v689_v30  ;;  %v892_v60 = vpop.f32.mrf.mxu1 }
 0x16b   : > { %v3333_v61 = vpop.f32.mrf.mxu0 }
 0x16c   : > { %v931_v62 = vadd.f32 %v892_v60, %v810_v59  ;;  %v813_v63 = vadd.f32 %v3333_v61, %v692_v34  ;;  %v3353_v0 = vpop.f32.mrf.mxu1 }
 0x16d   : > { %v781_v1 = vpop.f32.mrf.mxu0 }
 0x16e   : > { %v934_v2 = vadd.f32 %v3353_v0, %v813_v63  ;;  %v812_v3 = vadd.f32 %v781_v1, %v691_v38  ;;  %v902_v4 = vpop.f32.mrf.mxu1 }
 0x16f   : > { %v3336_v5 = vpop.f32.mrf.mxu0 }
 0x170   : > { %v933_v6 = vadd.f32 %v902_v4, %v812_v3  ;;  %v815_v7 = vadd.f32 %v3336_v5, %v694_v42  ;;  %v3356_v8 = vpop.f32.mrf.mxu1 }
 0x171   : > { %v791_v9 = vpop.f32.mrf.mxu0 }
 0x172   : > { %v936_v10 = vadd.f32 %v3356_v8, %v815_v7  ;;  %v814_v11 = vadd.f32 %v791_v9, %v693_v46  ;;  %v912_v12 = vpop.f32.mrf.mxu1 }
 0x173   : > { %v3339_v13 = vpop.f32.mrf.mxu0 }
 0x174   : > { %v935_v14 = vadd.f32 %v912_v12, %v814_v11  ;;  %v817_v15 = vadd.f32 %v3339_v13, %v696_v50  ;;  %v3359_v16 = vpop.f32.mrf.mxu1 }
 0x175   : > { %v801_v17 = vpop.f32.mrf.mxu0 }
 0x176   : > { %v938_v18 = vadd.f32 %v3359_v16, %v817_v15  ;;  %v816_v19 = vadd.f32 %v801_v17, %v695_v54  ;;  %v922_v20 = vpop.f32.mrf.mxu1 }
 0x177   : > { %v3370_v21 = vpop.f32.mrf.mxu0 }
 0x178   : > { %v937_v22 = vadd.f32 %v922_v20, %v816_v19  ;;  %v1053_v23 = vadd.f32 %v3370_v21, %v932_v58  ;;  %v3390_v24 = vpop.f32.mrf.mxu1 }
 0x179   : > { %v1013_v25 = vpop.f32.mrf.mxu0 }
 0x17a   : > { %v4544_v26 = vadd.f32 %v3390_v24, %v1053_v23  ;;  %v1052_v27 = vadd.f32 %v1013_v25, %v931_v62  ;;  %v1134_v28 = vpop.f32.mrf.mxu1 }
 0x17b   : > { %v3373_v29 = vpop.f32.mrf.mxu0 }
 0x17c   : > { %v4546_v30 = vadd.f32 %v1134_v28, %v1052_v27  ;;  %v1055_v31 = vadd.f32 %v3373_v29, %v934_v2  ;;  %v3393_v32 = vpop.f32.mrf.mxu1 }
 0x17d   : > { %v1023_v33 = vpop.f32.mrf.mxu0 }
 0x17e   : > { %v4548_v34 = vadd.f32 %v3393_v32, %v1055_v31  ;;  %v1054_v35 = vadd.f32 %v1023_v33, %v933_v6  ;;  %v1144_v36 = vpop.f32.mrf.mxu1 }
 0x17f   : > { %v3376_v37 = vpop.f32.mrf.mxu0 }
 0x180   : > { %v4550_v38 = vadd.f32 %v1144_v36, %v1054_v35  ;;  %v1057_v39 = vadd.f32 %v3376_v37, %v936_v10  ;;  %v3396_v40 = vpop.f32.mrf.mxu1 }
 0x181   : > { %v1033_v41 = vpop.f32.mrf.mxu0 }
 0x182   : > { %v4552_v42 = vadd.f32 %v3396_v40, %v1057_v39  ;;  %v1056_v43 = vadd.f32 %v1033_v41, %v935_v14  ;;  %v1154_v44 = vpop.f32.mrf.mxu1 }
 0x183   : > { %v3379_v45 = vpop.f32.mrf.mxu0 }
 0x184   : > { %v4554_v46 = vadd.f32 %v1154_v44, %v1056_v43  ;;  %v1059_v47 = vadd.f32 %v3379_v45, %v938_v18  ;;  %v3399_v48 = vpop.f32.mrf.mxu1 }
 0x185   : > { %v1043_v49 = vpop.f32.mrf.mxu0 }
 0x186   : > { %v4556_v50 = vadd.f32 %v3399_v48, %v1059_v47  ;;  %v1058_v51 = vadd.f32 %v1043_v49, %v937_v22  ;;  %v1164_v52 = vpop.f32.mrf.mxu1 }
 0x187   : > { %v3410_v53 = vpop.f32.mrf.mxu0 }
 0x188   : > { %v4558_v54 = vadd.f32 %v1164_v52, %v1058_v51  ;;  %v3430_v55 = vpop.f32.mrf.mxu1  ;;  %v1336_v47 = vadd.f32 %v3410_v53, %v4544_v26 }
 0x189   : > { %v1296_v56 = vpop.f32.mrf.mxu0 }
 0x18a   : > { %v1438_v57 = vpop.f32.mrf.mxu1  ;;  %v1335_v51 = vadd.f32 %v1296_v56, %v4546_v30 }
 0x18b   : > { %v3413_v58 = vpop.f32.mrf.mxu0 }
 0x18c   : > { %v3433_v59 = vpop.f32.mrf.mxu1 }
 0x18d   : > { %v1306_v60 = vpop.f32.mrf.mxu0 }
 0x18e   : > { %v4560_v61 = vpop.f32.mrf.mxu1  ;;  %v1337_v26 = vadd.f32 %v1306_v60, %v4550_v38 }
 0x18f   : > { %v3416_v62 = vpop.f32.mrf.mxu0 }
 0x190   : > { %v4562_v63 = vpop.f32.mrf.mxu1  ;;  %v1340_v56 = vadd.f32 %v3416_v62, %v4552_v42 }
 0x191   : > { %v1316_v0 = vpop.f32.mrf.mxu0 }
 0x192   : > { %v4564_v1 = vpop.f32.mrf.mxu1  ;;  %v1482_v42 = vadd.f32 %v4562_v63, %v1340_v56 }
 0x193   : > { %v4566_v2 = vpop.f32.mrf.mxu0 }
 0x194   : > { %v4568_v3 = vpop.f32.mrf.mxu1  ;;  %v1342_v60 = vadd.f32 %v4566_v2, %v4556_v50 }
 0x195   : > { %v4570_v4 = vpop.f32.mrf.mxu0 }
 0x196   : > { %v4572_v5 = vpop.f32.mrf.mxu1 }
 0x197   : > { %v3450_v6 = vpop.f32.mrf.mxu0 }
 0x198   : > { %v3470_v7 = vpop.f32.mrf.mxu1 }
 0x199   : > { %v1559_v8 = vpop.f32.mrf.mxu0 }
 0x19a   : > { %v1680_v9 = vpop.f32.mrf.mxu1 }
 0x19b   : > { %v3453_v10 = vpop.f32.mrf.mxu0 }
 0x19c   : > { %v4574_v11 = vpop.f32.mrf.mxu1 }
 0x19d   : > { %v1569_v12 = vpop.f32.mrf.mxu0 }
 0x19e   : > { %v4576_v13 = vpop.f32.mrf.mxu1 }
 0x19f   : > { %v4578_v14 = vpop.f32.mrf.mxu0 }
 0x1a0   : > { %v4580_v15 = vpop.f32.mrf.mxu1 }
 0x1a1   : > { %v4582_v16 = vpop.f32.mrf.mxu0 }
 0x1a2   : > { %v4584_v17 = vpop.f32.mrf.mxu1 }
 0x1a3   : > { %v4586_v18 = vpop.f32.mrf.mxu0 }
 0x1a4   : > { %v4588_v19 = vpop.f32.mrf.mxu1 }
 0x1a5   : > { %v4590_v20 = vpop.f32.mrf.mxu0 }
 0x1a6   : > { %v4592_v21 = vpop.f32.mrf.mxu1 }
 0x1a7   : > { %4788 = vst [vmem:[#allocation18_spill] sm:$0xff] %v4592_v21  ;;  %v3490_v22 = vpop.f32.mrf.mxu0 }
 0x1a8   : > { %v3510_v23 = vpop.f32.mrf.mxu1 }
 0x1a9   : > { %v1801_v24 = vpop.f32.mrf.mxu0 }
 0x1aa   : > { %v4594_v25 = vpop.f32.mrf.mxu1 }
 0x1ab   : > { %v3493_v27 = vpop.f32.mrf.mxu0 }
 0x1ac   : > { %v4596_v28 = vpop.f32.mrf.mxu1 }
 0x1ad   : > { %v4598_v29 = vpop.f32.mrf.mxu0 }
 0x1ae   : > { %v4600_v31 = vpop.f32.mrf.mxu1 }
 0x1af   : > { %v4602_v32 = vpop.f32.mrf.mxu0 }
 0x1b0   : > { %v4604_v33 = vpop.f32.mrf.mxu1 }
 0x1b1   : > { %4789 = vst [vmem:[#allocation19_spill] sm:$0xff] %v4604_v33  ;;  %v4606_v35 = vpop.f32.mrf.mxu0 }
 0x1b2   : > { %v4608_v36 = vpop.f32.mrf.mxu1 }
 0x1b3   : > { %4790 = vst [vmem:[#allocation20_spill] sm:$0xff] %v4608_v36  ;;  %v4610_v37 = vpop.f32.mrf.mxu0 }
 0x1b4   : > { %4791 = vst [vmem:[#allocation21_spill] sm:$0xff] %v4610_v37  ;;  %v4612_v39 = vpop.f32.mrf.mxu1  ;;  %v1477_v37 = vadd.f32 %v1438_v57, %v1335_v51 }
 0x1b5   : > { %4792 = vst [vmem:[#allocation22_spill] sm:$0xff] %v4612_v39  ;;  %v4614_v40 = vpop.f32.mrf.mxu0  ;;  %v1478_v39 = vadd.f32 %v3430_v55, %v1336_v47 }
 0x1b6   : > { %4793 = vst [vmem:[#allocation23_spill] sm:$0xff] %v4614_v40  ;;  %v4616_v41 = vpop.f32.mrf.mxu1  ;;  %v1338_v40 = vadd.f32 %v3413_v58, %v4548_v34  ;;  %v1339_v34 = vadd.f32 %v1316_v0, %v4554_v46  ;;  %v1479_v58 = vadd.f32 %v4560_v61, %v1337_v26  ;;  %v1341_v61 = vadd.f32 %v4570_v4, %v4558_v54 }
 0x1b7   : > { %4794 = vst [vmem:[#allocation24_spill] sm:$0xff] %v4616_v41  ;;  %v3530_v43 = vpop.f32.mrf.mxu0  ;;  %v1599_v53 = vadd.f32 %v3450_v6, %v1478_v39  ;;  %v1484_v39 = vadd.f32 %v4568_v3, %v1342_v60 }
 0x1b8   : > { %v4618_v44 = vpop.f32.mrf.mxu1  ;;  %v1480_v30 = vadd.f32 %v3433_v59, %v1338_v40  ;;  %v1600_v62 = vadd.f32 %v1569_v12, %v1479_v58  ;;  %v1481_v46 = vadd.f32 %v4564_v1, %v1339_v34  ;;  %v1483_v51 = vadd.f32 %v4572_v5, %v1341_v61 }
 0x1b9   : > { %v2084_v45 = vpop.f32.mrf.mxu0  ;;  %v1720_v57 = vadd.f32 %v3470_v7, %v1599_v53  ;;  %v1605_v54 = vadd.f32 %v4586_v18, %v1484_v39 }
 0x1ba   : > { %v4621_v48 = vpop.f32.mrf.mxu1  ;;  %v1601_v47 = vadd.f32 %v3453_v10, %v1480_v30  ;;  %v1603_v10 = vadd.f32 %v4578_v14, %v1482_v42  ;;  %v1602_v63 = vadd.f32 %v4582_v16, %v1481_v46  ;;  %v1721_v12 = vadd.f32 %v4576_v13, %v1600_v62 }
 0x1bb   : > { %4795 = vst [vmem:[#allocation25_spill] sm:$0xff] %v4621_v48  ;;  %v4623_v49 = vpop.f32.mrf.mxu0  ;;  %v1604_v13 = vadd.f32 %v4590_v20, %v1483_v51  ;;  %v1726_v53 = vadd.f32 %v4588_v19, %v1605_v54  ;;  %v4798_v20 = vld [vmem:[#allocation18_spill] sm:$0xff]  ;;  %v4799_v34 = vld [vmem:[#allocation21_spill] sm:$0xff] }
 0x1bc   : > { %v4626_v52 = vpop.f32.mrf.mxu1  ;;  %v1722_v7 = vadd.f32 %v4574_v11, %v1601_v47  ;;  %v1724_v11 = vadd.f32 %v4580_v15, %v1603_v10  ;;  %v1723_v16 = vadd.f32 %v4584_v17, %v1602_v63 }
 0x1bd   : > { %4796 = vst [vmem:[#allocation26_spill] sm:$0xff] %v4626_v52  ;;  %v4628_v36 = vpop.f32.mrf.mxu0  ;;  %v1598_v52 = vadd.f32 %v1559_v8, %v1477_v37  ;;  %v1841_v8 = vadd.f32 %v3490_v22, %v1720_v57  ;;  %v1725_v56 = vadd.f32 %v4798_v20, %v1604_v13  ;;  %v4804_v62 = vld [vmem:[#allocation23_spill] sm:$0xff] }
 0x1be   : > { %4797 = vst [vmem:[#allocation27_spill] sm:$0xff] %v4628_v36  ;;  %v4631_v41 = vpop.f32.mrf.mxu1  ;;  %v1843_v40 = vadd.f32 %v3493_v27, %v1722_v7  ;;  %v1845_v5 = vadd.f32 %v4602_v32, %v1724_v11  ;;  %v1844_v15 = vadd.f32 %v4606_v35, %v1723_v16  ;;  %v4800_v32 = vld [vmem:[#allocation19_spill] sm:$0xff]  ;;  %v4807_v54 = vld [vmem:[#allocation24_spill] sm:$0xff] }
 0x1bf   : > { %v4633_v33 = vpop.f32.mrf.mxu0  ;;  %v1719_v59 = vadd.f32 %v1680_v9, %v1598_v52  ;;  %v1962_v22 = vadd.f32 %v3510_v23, %v1841_v8 }
 0x1c0   : > { %v4636_v48 = vpop.f32.mrf.mxu1  ;;  %v1964_v27 = vadd.f32 %v4596_v28, %v1843_v40  ;;  %v1847_v28 = vadd.f32 %v4799_v34, %v1726_v53 }
 0x1c1   : > { %v4638_v21 = vpop.f32.mrf.mxu0  ;;  %v1840_v50 = vadd.f32 %v1801_v24, %v1719_v59  ;;  %v1842_v24 = vadd.f32 %v4598_v29, %v1721_v12  ;;  %v2124_v3 = vadd.f32 %v3530_v43, %v1962_v22  ;;  %v4803_v59 = vld [vmem:[#allocation20_spill] sm:$0xff] }
 0x1c2   : > { %v4641_v36 = vpop.f32.mrf.mxu1  ;;  %v2126_v17 = vadd.f32 %v4623_v49, %v1964_v27  ;;  %v4801_v57 = vld [vmem:[#allocation25_spill] sm:$0xff] }
 0x1c3   : > { %v4644_v55 = vpop.f32.mrf.mxu0  ;;  %v1961_v14 = vadd.f32 %v4594_v25, %v1840_v50  ;;  %v1963_v29 = vadd.f32 %v4600_v31, %v1842_v24  ;;  %v2266_v43 = vadd.f32 %v4618_v44, %v2124_v3  ;;  %v1965_v31 = vadd.f32 %v4803_v59, %v1844_v15  ;;  %v4806_v50 = vld [vmem:[#allocation22_spill] sm:$0xff] }
 0x1c4   : > { %v4647_v38 = vpop.f32.mrf.mxu1  ;;  %v1846_v44 = vadd.f32 %v4804_v62, %v1725_v56  ;;  %v4805_v49 = vld [vmem:[#allocation26_spill] sm:$0xff]  ;;  %v1968_v39 = vadd.f32 %v4806_v50, %v1847_v28 }
 0x1c5   : > { %v4651_v6 = vpop.f32.mrf.mxu0  ;;  %v2123_v26 = vadd.f32 %v2084_v45, %v1961_v14  ;;  %v1966_v45 = vadd.f32 %v4800_v32, %v1845_v5  ;;  %v4802_v19 = vld [vmem:[#allocation27_spill] sm:$0xff]  ;;  %v2268_v46 = vadd.f32 %v4805_v49, %v2126_v17  ;;  %v2127_v63 = vadd.f32 %v4638_v21, %v1965_v31 }
 0x1c6   : > { %v4654_v37 = vpop.f32.mrf.mxu1  ;;  %v2125_v60 = vadd.f32 %v4802_v19, %v1963_v29  ;;  %v1967_v11 = vadd.f32 %v4807_v54, %v1846_v44  ;;  %v2130_v14 = vadd.f32 %v4644_v55, %v1968_v39 }
 0x1c7   : > { %v3570_v0 = vpop.f32.mrf.mxu0  ;;  %v2265_v47 = vadd.f32 %v4801_v57, %v2123_v26  ;;  %v2128_v61 = vadd.f32 %v4633_v33, %v1966_v45  ;;  %v2269_v21 = vadd.f32 %v4641_v36, %v2127_v63 }
 0x1c8   : > { %v3590_v2 = vpop.f32.mrf.mxu1  ;;  %v2387_v35 = vadd.f32 %v3570_v0, %v2266_v43  ;;  %v2267_v22 = vadd.f32 %v4631_v41, %v2125_v60  ;;  %v2129_v27 = vadd.f32 %v4651_v6, %v1967_v11  ;;  %v2272_v55 = vadd.f32 %v4647_v38, %v2130_v14 }
 0x1c9   : > { %v2347_v9 = vpop.f32.mrf.mxu0  ;;  %v2270_v3 = vadd.f32 %v4636_v48, %v2128_v61 }
 0x1ca   : > { %v2468_v1 = vpop.f32.mrf.mxu1  ;;  %v2386_v7 = vadd.f32 %v2347_v9, %v2265_v47  ;;  %v2508_v0 = vadd.f32 %v3590_v2, %v2387_v35 }
 0x1cb   : > { %v3573_v4 = vpop.f32.mrf.mxu0 }
 0x1cc   : > { %v3593_v52 = vpop.f32.mrf.mxu1  ;;  %v2389_v40 = vadd.f32 %v3573_v4, %v2268_v46  ;;  %v2507_v33 = vadd.f32 %v2468_v1, %v2386_v7 }
 0x1cd   : > { %v2357_v23 = vpop.f32.mrf.mxu0 }
 0x1ce   : > { %v2478_v18 = vpop.f32.mrf.mxu1  ;;  %v2388_v9 = vadd.f32 %v2357_v23, %v2267_v22  ;;  %v2510_v2 = vadd.f32 %v3593_v52, %v2389_v40  ;;  %v2271_v52 = vadd.f32 %v4654_v37, %v2129_v27 }
 0x1cf   : > { %v3576_v25 = vpop.f32.mrf.mxu0 }
 0x1d0   : > { %v3596_v30 = vpop.f32.mrf.mxu1  ;;  %v2391_v4 = vadd.f32 %v3576_v25, %v2270_v3  ;;  %v2509_v29 = vadd.f32 %v2478_v18, %v2388_v9 }
 0x1d1   : > { %v2367_v58 = vpop.f32.mrf.mxu0 }
 0x1d2   : > { %v2488_v42 = vpop.f32.mrf.mxu1  ;;  %v2390_v48 = vadd.f32 %v2367_v58, %v2269_v21  ;;  %v2512_v25 = vadd.f32 %v3596_v30, %v2391_v4 }
 0x1d3   : > { %v3579_v8 = vpop.f32.mrf.mxu0 }
 0x1d4   : > { %v3599_v10 = vpop.f32.mrf.mxu1  ;;  %v2393_v43 = vadd.f32 %v3579_v8, %v2272_v55  ;;  %v2511_v56 = vadd.f32 %v2488_v42, %v2390_v48 }
 0x1d5   : > { %v2377_v12 = vpop.f32.mrf.mxu0 }
 0x1d6   : > { %v2498_v51 = vpop.f32.mrf.mxu1  ;;  %v2392_v34 = vadd.f32 %v2377_v12, %v2271_v52  ;;  %v2514_v37 = vadd.f32 %v3599_v10, %v2393_v43 }
 0x1d7   : > { %v3610_v24 = vpop.f32.mrf.mxu0 }
 0x1d8   : > { %v2629_v16 = vadd.f32 %v3610_v24, %v2508_v0  ;;  %v3630_v13 = vpop.f32.mrf.mxu1  ;;  %v2513_v60 = vadd.f32 %v2498_v51, %v2392_v34 }
 0x1d9   : > { %v2589_v41 = vpop.f32.mrf.mxu0 }
 0x1da   : > { %v2750_v5 = vadd.f32 %v3630_v13, %v2629_v16  ;;  %v2628_v26 = vadd.f32 %v2589_v41, %v2507_v33  ;;  %v2710_v53 = vpop.f32.mrf.mxu1 }
 0x1db   : > { %v3613_v15 = vpop.f32.mrf.mxu0 }
 0x1dc   : > { %2758 = vst [vmem:[%s4697_s11 + $0x8] sm:$0xff] %v2750_v5  ;;  %v2749_v36 = vadd.f32 %v2710_v53, %v2628_v26  ;;  %v2631_v1 = vadd.f32 %v3613_v15, %v2510_v2  ;;  %v3633_v6 = vpop.f32.mrf.mxu1 }
 0x1dd   : > { %v2599_v23 = vpop.f32.mrf.mxu0 }
 0x1de   : > { %2757 = vst [vmem:[%s4697_s11] sm:$0xff] %v2749_v36  ;;  %v2752_v38 = vadd.f32 %v3633_v6, %v2631_v1  ;;  %v2630_v18 = vadd.f32 %v2599_v23, %v2509_v29  ;;  %v2720_v17 = vpop.f32.mrf.mxu1 }
 0x1df   : > { %v3616_v20 = vpop.f32.mrf.mxu0 }
 0x1e0   : > { %2760 = vst [vmem:[%s4697_s11 + $0x18] sm:$0xff] %v2752_v38  ;;  %v2751_v28 = vadd.f32 %v2720_v17, %v2630_v18  ;;  %v2633_v58 = vadd.f32 %v3616_v20, %v2512_v25  ;;  %v3636_v32 = vpop.f32.mrf.mxu1 }
 0x1e1   : > { %v2609_v45 = vpop.f32.mrf.mxu0 }
 0x1e2   : > { %2759 = vst [vmem:[%s4697_s11 + $0x10] sm:$0xff] %v2751_v28  ;;  %v2754_v30 = vadd.f32 %v3636_v32, %v2633_v58  ;;  %v2632_v57 = vadd.f32 %v2609_v45, %v2511_v56  ;;  %v2730_v47 = vpop.f32.mrf.mxu1 }
 0x1e3   : > { %v3619_v19 = vpop.f32.mrf.mxu0 }
 0x1e4   : > { %2762 = vst [vmem:[%s4697_s11 + $0x28] sm:$0xff] %v2754_v30  ;;  %v2753_v35 = vadd.f32 %v2730_v47, %v2632_v57  ;;  %v2635_v42 = vadd.f32 %v3619_v19, %v2514_v37  ;;  %v3639_v59 = vpop.f32.mrf.mxu1 }
 0x1e5   : > { %v2619_v31 = vpop.f32.mrf.mxu0 }
 0x1e6   : > { %2761 = vst [vmem:[%s4697_s11 + $0x20] sm:$0xff] %v2753_v35  ;;  %v2756_v62 = vadd.f32 %v3639_v59, %v2635_v42  ;;  %v2634_v44 = vadd.f32 %v2619_v31, %v2513_v60  ;;  %v2740_v8 = vpop.f32.mrf.mxu1 }
 0x1e8   : > { %2764 = vst [vmem:[%s4697_s11 + $0x38] sm:$0xff] %v2756_v62  ;;  %v2755_v49 = vadd.f32 %v2740_v8, %v2634_v44 }
 0x1ea   : > { %2763 = vst [vmem:[%s4697_s11 + $0x30] sm:$0xff] %v2755_v49 }
 0x1eb   : > { %3838 = shalt.err (!%p3835_p4)
}
 0x1ec   : > { %s3839_s28 = scalar_lea.hbm %s4713_s8, 1024  ;;  %s3843_s17 = scalar_lea.hbm %s4763_s5, 2048 }
 0x1ed   : > { %p3840_p5 = scmp.ne.s32.totalorder %s4713_s8, %s3839_s28  ;;  %p3844_p2 = scmp.lt.s32.totalorder %s4713_s8, %s4763_s5 }
 0x1ee   : > { %p3845_p6 = scmp.lt.s32.totalorder %s3843_s17, %s3839_s28 }
 0x1ef   : > { %p3841_p7 = pnand %p3840_p5, %p4808_p10 }
 0x1f0   : > { %p3846_p12 = por %p3845_p6, %p3844_p2 }
 0x1f1   : > { %p3842_p8 = pneg %p3841_p7 }
 0x1f3   : > { %p3847_p0 = pnand %p3846_p12, %p3842_p8 }
 0x1f5   : > { %3850 = shalt.err (!%p3847_p0)
}
 0x1f6   : > { %s3911_s9 = smov 128   ;;  %s3912_s11 = smov 8  }
 0x1f7   : > { %3652 = dma.vmem_to_hbm [thread:$0]  (%p4808_p10), %s4707_s16, 1024, %s4713_s8, %s2766_s10, %s3911_s9, %s3911_s9, %s3912_s11  }
 0x1f8 PF: > { %s2794_s2 = sand.u32 1, %s3889_s18   ;;  %p4809_p3 = scmp.ne.s32.totalorder %s4774_s25, 0 }
 0x1f9   : > { %p4810_p11 = scmp.ge.s32.totalorder %s3901_s21, 2  ;;  %s2795_s29 = scalar_lea.sflag [#allocation6], %s2794_s2 }
 0x1fb   : > { %p3669_p9 = pnand %p4810_p11, %p4809_p3 }
 0x1fd   : > { %p3670_p13 = pneg %p3669_p9 }
 0x1ff   : > { %3884 = dma.done.wait (%p3670_p13), %s2795_s29, 1024  }
 0x200   : > { %3886 = vsyncadd (%p3670_p13), %s2795_s29, 4294966272  ;;  %p22_p1 = scmp.ge.s32.totalorder %s4021_s15, 4   ;;  %s4811_s18 = smov %s3893_s19 }
 0x201   : > { %s4812_s19 = smov %s3897_s20  ;;  %s4813_s20 = smov %s4037_s27 }
 0x202   : > { %s4814_s21 = smov %s4021_s15  ;;  %24 = sbr.rel (!%p22_p1) target bundleno = 11 (0xb), region = 124 }
 0x207   :  { %2800 = vsyncpa [#allocation5], 1 }
 0x208   :  { %2802 = vsyncpa [#allocation5 + $0x1], 1 }
 0x209   :  { %2803 = vsyncpa [#allocation8], 1 }
 0x20a   :  { %2805 = vsyncpa [#allocation8 + $0x1], 1 }
 0x20b   :  { %2806 = vsyncpa [#allocation11], 1 }
 0x20c   :  { %2807 = vsyncpa [#allocation6], 1 }
 0x20d   :  { %2809 = vsyncpa [#allocation6 + $0x1], 1 }

</bundles_post_ra>
